<compile_context>
chip_gen: v7x
topology: tpu7x:2x2x1
jax: 0.10.0
libtpu: 0.0.40
codegen_flags: <defaults>
</compile_context>

<pallas_src>
import math
import numpy as np
import jax
import jax.numpy as jnp
from jax.experimental import pallas as pl
from jax.experimental.pallas import tpu as pltpu

T = 750            # time samples
H = 2              # EEG electrode rows (conv "height")
C1 = 16            # firstconv channels
C2 = 32            # depthwise / separable channels
K1, PAD1 = 51, 25
K3, PAD3 = 15, 7
T1 = T             # 750 after firstconv
T2 = T1 // 4       # 187 after AvgPool(1,4)
T3 = T2 // 8       # 23  after AvgPool(1,8)
TP = T2 + 2 * PAD3 # 201 zero-padded pooled length (separable conv input)
FLAT = C2 * T3     # 736
NCLASS = 2
KW1 = H * K1 + 1   # 103: im2col rows + ones row (bias fold)
KW3 = K3 * C2 + 1  # 481: stacked taps*channels + ones row (bias fold)


def _elu(x):
    return jnp.where(x > 0, x, jnp.exp(jnp.minimum(x, 0.0)) - 1.0)


def eegnet_kernel(win_ref, wf_ref, p4_ref, w3_ref, wfc_ref, bfc_ref,
                  out_ref, pad_ref, stk_ref):
    bb = win_ref.shape[0]

    # Ones row for the separable-stage bias fold (row 480 of stk).  Rows 0..479
    # are rewritten per sample below; this row is rewritten every grid step so it
    # is valid on every core under megacore grid splitting.
    stk_ref[K3 * C2:K3 * C2 + 1, :] = jnp.ones((1, T2), jnp.bfloat16)

    wf = wf_ref[...]      # (32, 103) bf16: conv1*BN1*depthwise*BN2 folded + bias col
    w3 = w3_ref[...]      # (32, 481) bf16: separable conv, BN3 scale folded + bias col
    bfc = bfc_ref[...]    # (1, 2) f32

    @pl.loop(0, bb)
    def _sample(b):
        # ---- firstconv + BN1 + depthwise + BN2 (+bias via ones row): one MXU matmul
        h2 = jnp.dot(wf, win_ref[b], preferred_element_type=jnp.float32)   # (32, 750) f32
        h2 = _elu(h2).astype(jnp.bfloat16)

        # ---- AvgPool(1,4); bf16 pool matrix directly emits the zero-padded input
        pad_ref[...] = jnp.dot(h2, p4_ref[...],
                               preferred_element_type=jnp.float32).astype(jnp.bfloat16)

        # ---- separableConv + BN3: stack 15 shifted bf16 windows, single K=481 matmul
        for k in range(K3):
            stk_ref[k * C2:(k + 1) * C2, :] = pad_ref[:, k:k + T2]
        h3 = _elu(jnp.dot(w3, stk_ref[...],
                          preferred_element_type=jnp.float32))              # (32, 187) f32

        # ---- classify: AvgPool(1,8) folded into FC weight; reduce over 187 lanes
        prods = wfc_ref[...] * h3[None, :, :]                               # (2, 32, 187)
        logits = jnp.sum(jnp.sum(prods, axis=2), axis=1)                    # (2,)
        out_ref[b] = logits[None, :] + bfc                                  # (1, 2)


def eegnet_forward(x, kernel_args, bb=16):
    """x: (B, 1, 2, 750) float32 (NCHW like the PyTorch module). Returns (B, 2) logits."""
    B = x.shape[0]
    bb = max(1, math.gcd(B, bb))
    wf_b, p4_pad, w3_b, wfc_p8, bfc = kernel_args

    # XLA-side layout prep (bf16): pad time, build im2col windows, append ones row.
    xp = jnp.pad(x[:, 0], ((0, 0), (0, 0), (PAD1, PAD1))).astype(jnp.bfloat16)  # (B, 2, 800)
    win = jnp.stack([xp[:, :, k:k + T1] for k in range(K1)], axis=2)            # (B, 2, 51, 750)
    win = win.reshape(B, H * K1, T1)                                            # (B, 102, 750)
    win = jnp.concatenate([win, jnp.ones((B, 1, T1), jnp.bfloat16)], axis=1)    # (B, 103, 750)

    def full(shape):
        n = len(shape)
        return pl.BlockSpec(shape, lambda i, n=n: (0,) * n)

    out = pl.pallas_call(
        eegnet_kernel,
        out_shape=jax.ShapeDtypeStruct((B, 1, NCLASS), jnp.float32),
        grid_spec=pltpu.PrefetchScalarGridSpec(
            num_scalar_prefetch=0,
            grid=(B // bb,),
            in_specs=[
                pl.BlockSpec((bb, KW1, T1), lambda i: (i, 0, 0)),  # bf16 im2col windows
                full((C2, KW1)),          # fused conv1/BN1/depthwise/BN2 weight + bias col
                full((T1, TP)),           # bf16 pool-4 matrix (emits zero-padded output)
                full((C2, KW3)),          # separable conv weight, s3 folded, taps stacked + bias col
                full((NCLASS, C2, T2)),   # FC weight with pool-8 folded (f32)
                full((1, NCLASS)),        # FC bias (f32)
            ],
            out_specs=pl.BlockSpec((bb, 1, NCLASS), lambda i: (i, 0, 0)),
            scratch_shapes=[
                pltpu.VMEM((C2, TP), jnp.bfloat16),   # padded pooled activation (32, 201)
                pltpu.VMEM((KW3, T2), jnp.bfloat16),  # stacked windows + ones row (481, 187)
            ],
        ),
        compiler_params=pltpu.CompilerParams(dimension_semantics=("parallel",)),
    )(win, wf_b, p4_pad, w3_b, wfc_p8, bfc)
    return out[:, 0, :]


def init_params(key):
    """Deterministic synthetic parameters following the torch module's shapes."""
    ks = jax.random.split(key, 18)
    eps = 1e-5

    def bn(kg, kb, km, kv, c):
        gamma = 1.0 + 0.1 * jax.random.normal(kg, (c,), jnp.float32)
        beta = 0.1 * jax.random.normal(kb, (c,), jnp.float32)
        mean = 0.1 * jax.random.normal(km, (c,), jnp.float32)
        var = 1.0 + 0.5 * jax.random.uniform(kv, (c,), jnp.float32)
        scale = gamma / jnp.sqrt(var + eps)
        bias = beta - mean * scale
        return scale, bias

    w1 = jax.random.normal(ks[0], (C1, K1), jnp.float32) / np.sqrt(K1)            # (16,1,1,51)
    s1, b1 = bn(ks[1], ks[2], ks[3], ks[4], C1)
    w2 = jax.random.normal(ks[5], (C2, 2), jnp.float32) / np.sqrt(2.0)            # (32,1,2,1)
    s2, b2 = bn(ks[6], ks[7], ks[8], ks[9], C2)
    w3 = jax.random.normal(ks[10], (C2, C2, K3), jnp.float32) / np.sqrt(C2 * K3)  # (32,32,1,15)
    s3, b3 = bn(ks[11], ks[12], ks[13], ks[14], C2)
    wfc = jax.random.normal(ks[15], (NCLASS, FLAT), jnp.float32) / np.sqrt(FLAT)
    bfc = 0.1 * jax.random.normal(ks[16], (NCLASS,), jnp.float32)

    # ---------------- offline folding (zero kernel cost) ----------------
    # firstconv + BN1 + depthwise + BN2 -> (32, 102) weight + (32,) bias; bias folded
    # into an extra weight column (the window matrix carries a matching ones row).
    s1w1 = s1[:, None] * w1                       # (16, 51)
    s1w1_r = jnp.repeat(s1w1, 2, axis=0)          # (32, 51)  row o = (s1*w1)[o//2]
    b1_r = jnp.repeat(b1, 2)                      # (32,)
    wf = (s2[:, None, None] * w2[:, :, None]) * s1w1_r[:, None, :]   # (32, 2, 51)
    wf = wf.reshape(C2, H * K1)                   # flat index = h*K1 + k
    b2f = s2 * b1_r * (w2[:, 0] + w2[:, 1]) + b2  # (32,)
    wf_b = jnp.concatenate([wf, b2f[:, None]], axis=1).astype(jnp.bfloat16)   # (32, 103)

    # pool-4 matrix that directly produces the zero-padded (32, 201) conv input
    # (values {0, 0.25} are exact in bf16; constant index_map -> DMA'd once per core)
    p4_pad = np.zeros((T1, TP), np.float32)
    idx = np.arange(T2 * 4)
    p4_pad[idx, PAD3 + idx // 4] = 0.25
    p4_pad = jnp.asarray(p4_pad).astype(jnp.bfloat16)

    # separable conv with BN3 scale folded; taps stacked along K; BN3 bias folded
    # into an extra column matched by the in-kernel ones row of the stk scratch.
    w3s = s3[:, None, None] * w3                                   # (32, 32, 15)
    w3_stk = jnp.transpose(w3s, (0, 2, 1)).reshape(C2, K3 * C2)    # [o, k*32 + c]
    w3_b = jnp.concatenate([w3_stk, b3[:, None]], axis=1).astype(jnp.bfloat16)  # (32, 481)

    # pool-8 folded into the classifier weight -> (2, 32, 187), kept in f32
    p8 = np.zeros((T2, T3), np.float32)
    j = np.arange(T3 * 8)
    p8[j, j // 8] = 0.125
    wfc3 = wfc.reshape(NCLASS, C2, T3)
    wfc_p8 = jnp.einsum('nos,ts->not', wfc3, jnp.asarray(p8))

    kernel_args = (wf_b, p4_pad, w3_b, wfc_p8, bfc[None, :])
    ref_params = dict(w1=w1, s1=s1, b1=b1, w2=w2, s2=s2, b2=b2,
                      w3=w3, s3=s3, b3=b3, wfc=wfc, bfc=bfc)
    return kernel_args, ref_params


def ref_forward(x, p):
    """Pure-JAX f32 reference mirroring the PyTorch forward (eval mode)."""
    B = x.shape[0]
    hi = jax.lax.Precision.HIGHEST
    xp = jnp.pad(x[:, 0], ((0, 0), (0, 0), (PAD1, PAD1)))               # (B,2,800)
    c = jnp.zeros((B, C1, H, T1), jnp.float32)
    for k in range(K1):
        c = c + p['w1'][:, k][None, :, None, None] * xp[:, None, :, k:k + T1]
    h1 = c * p['s1'][None, :, None, None] + p['b1'][None, :, None, None]
    h1r = jnp.repeat(h1, 2, axis=1)                                      # (B,32,2,750)
    h2 = jnp.einsum('boht,oh->bot', h1r, p['w2'], precision=hi)
    h2 = h2 * p['s2'][None, :, None] + p['b2'][None, :, None]
    h2 = _elu(h2)
    h2 = h2[:, :, :T2 * 4].reshape(B, C2, T2, 4).mean(-1)
    h2p = jnp.pad(h2, ((0, 0), (0, 0), (PAD3, PAD3)))
    acc = jnp.zeros((B, C2, T2), jnp.float32)
    for k in range(K3):
        acc = acc + jnp.einsum('oc,bct->bot', p['w3'][:, :, k],
                               h2p[:, :, k:k + T2], precision=hi)
    h3 = acc * p['s3'][None, :, None] + p['b3'][None, :, None]
    h3 = _elu(h3)
    h3 = h3[:, :, :T3 * 8].reshape(B, C2, T3, 8).mean(-1)
    flat = h3.reshape(B, FLAT)
    return jnp.einsum('bf,of->bo', flat, p['wfc'], precision=hi) + p['bfc'][None, :]


if __name__ == "__main__":
    key = jax.random.PRNGKey(0)
    kx, kp = jax.random.split(key)
    B = 32                                                    # bb=16 -> grid=(2,), even for v7x
    x = jax.random.normal(kx, (B, 1, H, T), jnp.float32)      # NCHW, as the PyTorch module expects
    kernel_args, ref_params = init_params(kp)

    fwd = jax.jit(eegnet_forward, static_argnames=("bb",))
    y = jax.block_until_ready(fwd(x, kernel_args, bb=16))

    y_ref = ref_forward(x, ref_params)
    assert y.shape == (B, NCLASS)
    assert np.isfinite(np.asarray(y)).all()
    np.testing.assert_allclose(np.asarray(y), np.asarray(y_ref), rtol=5e-2, atol=5e-2)
    print("KERNEL_OK")
</pallas_src>

<mosaic_0001>
module attributes {stable_mosaic.version = 11 : i64} {
  func.func @eegnet_kernel(%arg0: i32, %arg1: memref<16x103x750xbf16, #tpu.memory_space<vmem>>, %arg2: memref<32x103xbf16, #tpu.memory_space<vmem>>, %arg3: memref<750x201xbf16, #tpu.memory_space<vmem>>, %arg4: memref<32x481xbf16, #tpu.memory_space<vmem>>, %arg5: memref<2x32x187xf32, #tpu.memory_space<vmem>>, %arg6: memref<1x2xf32, #tpu.memory_space<vmem>>, %arg7: memref<16x1x2xf32, #tpu.memory_space<vmem>>, %arg8: memref<32x201xbf16, #tpu.memory_space<vmem>>, %arg9: memref<481x187xbf16, #tpu.memory_space<vmem>>) attributes {dimension_semantics = [#tpu.dimension_semantics<parallel>], iteration_bounds = array<i64: 2>, scalar_prefetch = 0 : i64, scratch_operands = 2 : i64, tpu.core_type = #tpu.core_type<tc>, window_params = [{transform_indices = @transform_0, window_bounds = array<i64: 16, 103, 750>}, {pipeline_mode = #tpu.pipeline_mode<synchronous>, transform_indices = @transform_1, window_bounds = array<i64: 32, 103>}, {pipeline_mode = #tpu.pipeline_mode<synchronous>, transform_indices = @transform_2, window_bounds = array<i64: 750, 201>}, {pipeline_mode = #tpu.pipeline_mode<synchronous>, transform_indices = @transform_3, window_bounds = array<i64: 32, 481>}, {pipeline_mode = #tpu.pipeline_mode<synchronous>, transform_indices = @transform_4, window_bounds = array<i64: 2, 32, 187>}, {pipeline_mode = #tpu.pipeline_mode<synchronous>, transform_indices = @transform_5, window_bounds = array<i64: 1, 2>}, {transform_indices = @transform_6, window_bounds = array<i64: 16, 1, 2>}]} {
    %cst = arith.constant 1.000000e+00 : bf16
    %0 = vector.broadcast %cst : bf16 to vector<1x187xbf16>
    %c480 = arith.constant 480 : index
    %c0 = arith.constant 0 : index
    %1 = vector.load %arg9[%c480, %c0] : memref<481x187xbf16, #tpu.memory_space<vmem>>, vector<1x187xbf16>
    tpu.vector_store %arg9[%c480, %c0], %0 {strides = array<i32>} : memref<481x187xbf16, #tpu.memory_space<vmem>>, vector<1x187xbf16>,
    %c0_0 = arith.constant 0 : index
    %c0_1 = arith.constant 0 : index
    %2 = vector.load %arg2[%c0_0, %c0_1] : memref<32x103xbf16, #tpu.memory_space<vmem>>, vector<32x103xbf16>
    %c0_2 = arith.constant 0 : index
    %c0_3 = arith.constant 0 : index
    %3 = vector.load %arg4[%c0_2, %c0_3] : memref<32x481xbf16, #tpu.memory_space<vmem>>, vector<32x481xbf16>
    %c0_4 = arith.constant 0 : index
    %c0_5 = arith.constant 0 : index
    %4 = vector.load %arg6[%c0_4, %c0_5] : memref<1x2xf32, #tpu.memory_space<vmem>>, vector<1x2xf32>
    %c0_i32 = arith.constant 0 : i32
    %c16_i32 = arith.constant 16 : i32
    %5 = arith.addi %c0_i32, %c16_i32 : i32
    %c1_i32 = arith.constant 1 : i32
    scf.for %arg10 = %c0_i32 to %5 step %c1_i32  : i32 {
      %c1_i32_7 = arith.constant 1 : i32
      %6 = arith.muli %arg10, %c1_i32_7 : i32
      %c0_i32_8 = arith.constant 0 : i32
      %7 = arith.addi %c0_i32_8, %6 : i32
      %8 = arith.index_cast %7 : i32 to index
      %c0_9 = arith.constant 0 : index
      %c0_10 = arith.constant 0 : index
      %9 = vector.load %arg1[%8, %c0_9, %c0_10] : memref<16x103x750xbf16, #tpu.memory_space<vmem>>, vector<1x103x750xbf16>
      %10 = vector.shape_cast %9 : vector<1x103x750xbf16> to vector<103x750xbf16>
      %cst_11 = arith.constant dense<0.000000e+00> : vector<32x750xf32>
      %11 = tpu.matmul %2, %10, %cst_11 {dimension_numbers = #tpu.dot_dimension_numbers<[1], [0], [0], [1], [0, 0, 1, 1], [], []>} : vector<32x103xbf16>, vector<103x750xbf16>, vector<32x750xf32> -> vector<32x750xf32>
      %cst_12 = arith.constant 0.000000e+00 : f32
      %12 = vector.broadcast %cst_12 : f32 to vector<32x750xf32>
      %13 = arith.cmpf ogt, %11, %12 : vector<32x750xf32>
      %cst_13 = arith.constant 0.000000e+00 : f32
      %14 = vector.broadcast %cst_13 : f32 to vector<32x750xf32>
      %15 = arith.minimumf %11, %14 : vector<32x750xf32>
      %16 = math.exp %15 : vector<32x750xf32>
      %cst_14 = arith.constant 1.000000e+00 : f32
      %17 = vector.broadcast %cst_14 : f32 to vector<32x750xf32>
      %18 = arith.subf %16, %17 : vector<32x750xf32>
      %19 = arith.select %13, %11, %18 : vector<32x750xi1>, vector<32x750xf32>
      %20 = arith.truncf %19 : vector<32x750xf32> to vector<32x750xbf16>
      %c0_15 = arith.constant 0 : index
      %c0_16 = arith.constant 0 : index
      %21 = vector.load %arg3[%c0_15, %c0_16] : memref<750x201xbf16, #tpu.memory_space<vmem>>, vector<750x201xbf16>
      %cst_17 = arith.constant dense<0.000000e+00> : vector<32x201xf32>
      %22 = tpu.matmul %20, %21, %cst_17 {dimension_numbers = #tpu.dot_dimension_numbers<[1], [0], [0], [1], [0, 0, 1, 1], [], []>} : vector<32x750xbf16>, vector<750x201xbf16>, vector<32x201xf32> -> vector<32x201xf32>
      %23 = arith.truncf %22 : vector<32x201xf32> to vector<32x201xbf16>
      %c0_18 = arith.constant 0 : index
      %c0_19 = arith.constant 0 : index
      %24 = vector.load %arg8[%c0_18, %c0_19] : memref<32x201xbf16, #tpu.memory_space<vmem>>, vector<32x201xbf16>
      tpu.vector_store %arg8[%c0_18, %c0_19], %23 {strides = array<i32>} : memref<32x201xbf16, #tpu.memory_space<vmem>>, vector<32x201xbf16>,
      %c0_20 = arith.constant 0 : index
      %c0_21 = arith.constant 0 : index
      %25 = vector.load %arg8[%c0_20, %c0_21] : memref<32x201xbf16, #tpu.memory_space<vmem>>, vector<32x187xbf16>
      %c0_22 = arith.constant 0 : index
      %c0_23 = arith.constant 0 : index
      %26 = vector.load %arg9[%c0_22, %c0_23] : memref<481x187xbf16, #tpu.memory_space<vmem>>, vector<32x187xbf16>
      tpu.vector_store %arg9[%c0_22, %c0_23], %25 {strides = array<i32>} : memref<481x187xbf16, #tpu.memory_space<vmem>>, vector<32x187xbf16>,
      %c0_24 = arith.constant 0 : index
      %c1 = arith.constant 1 : index
      %27 = vector.load %arg8[%c0_24, %c1] : memref<32x201xbf16, #tpu.memory_space<vmem>>, vector<32x187xbf16>
      %c32 = arith.constant 32 : index
      %c0_25 = arith.constant 0 : index
      %28 = vector.load %arg9[%c32, %c0_25] : memref<481x187xbf16, #tpu.memory_space<vmem>>, vector<32x187xbf16>
      tpu.vector_store %arg9[%c32, %c0_25], %27 {strides = array<i32>} : memref<481x187xbf16, #tpu.memory_space<vmem>>, vector<32x187xbf16>,
      %c0_26 = arith.constant 0 : index
      %c2 = arith.constant 2 : index
      %29 = vector.load %arg8[%c0_26, %c2] : memref<32x201xbf16, #tpu.memory_space<vmem>>, vector<32x187xbf16>
      %c64 = arith.constant 64 : index
      %c0_27 = arith.constant 0 : index
      %30 = vector.load %arg9[%c64, %c0_27] : memref<481x187xbf16, #tpu.memory_space<vmem>>, vector<32x187xbf16>
      tpu.vector_store %arg9[%c64, %c0_27], %29 {strides = array<i32>} : memref<481x187xbf16, #tpu.memory_space<vmem>>, vector<32x187xbf16>,
      %c0_28 = arith.constant 0 : index
      %c3 = arith.constant 3 : index
      %31 = vector.load %arg8[%c0_28, %c3] : memref<32x201xbf16, #tpu.memory_space<vmem>>, vector<32x187xbf16>
      %c96 = arith.constant 96 : index
      %c0_29 = arith.constant 0 : index
      %32 = vector.load %arg9[%c96, %c0_29] : memref<481x187xbf16, #tpu.memory_space<vmem>>, vector<32x187xbf16>
      tpu.vector_store %arg9[%c96, %c0_29], %31 {strides = array<i32>} : memref<481x187xbf16, #tpu.memory_space<vmem>>, vector<32x187xbf16>,
      %c0_30 = arith.constant 0 : index
      %c4 = arith.constant 4 : index
      %33 = vector.load %arg8[%c0_30, %c4] : memref<32x201xbf16, #tpu.memory_space<vmem>>, vector<32x187xbf16>
      %c128 = arith.constant 128 : index
      %c0_31 = arith.constant 0 : index
      %34 = vector.load %arg9[%c128, %c0_31] : memref<481x187xbf16, #tpu.memory_space<vmem>>, vector<32x187xbf16>
      tpu.vector_store %arg9[%c128, %c0_31], %33 {strides = array<i32>} : memref<481x187xbf16, #tpu.memory_space<vmem>>, vector<32x187xbf16>,
      %c0_32 = arith.constant 0 : index
      %c5 = arith.constant 5 : index
      %35 = vector.load %arg8[%c0_32, %c5] : memref<32x201xbf16, #tpu.memory_space<vmem>>, vector<32x187xbf16>
      %c160 = arith.constant 160 : index
      %c0_33 = arith.constant 0 : index
      %36 = vector.load %arg9[%c160, %c0_33] : memref<481x187xbf16, #tpu.memory_space<vmem>>, vector<32x187xbf16>
      tpu.vector_store %arg9[%c160, %c0_33], %35 {strides = array<i32>} : memref<481x187xbf16, #tpu.memory_space<vmem>>, vector<32x187xbf16>,
      %c0_34 = arith.constant 0 : index
      %c6 = arith.constant 6 : index
      %37 = vector.load %arg8[%c0_34, %c6] : memref<32x201xbf16, #tpu.memory_space<vmem>>, vector<32x187xbf16>
      %c192 = arith.constant 192 : index
      %c0_35 = arith.constant 0 : index
      %38 = vector.load %arg9[%c192, %c0_35] : memref<481x187xbf16, #tpu.memory_space<vmem>>, vector<32x187xbf16>
      tpu.vector_store %arg9[%c192, %c0_35], %37 {strides = array<i32>} : memref<481x187xbf16, #tpu.memory_space<vmem>>, vector<32x187xbf16>,
      %c0_36 = arith.constant 0 : index
      %c7 = arith.constant 7 : index
      %39 = vector.load %arg8[%c0_36, %c7] : memref<32x201xbf16, #tpu.memory_space<vmem>>, vector<32x187xbf16>
      %c224 = arith.constant 224 : index
      %c0_37 = arith.constant 0 : index
      %40 = vector.load %arg9[%c224, %c0_37] : memref<481x187xbf16, #tpu.memory_space<vmem>>, vector<32x187xbf16>
      tpu.vector_store %arg9[%c224, %c0_37], %39 {strides = array<i32>} : memref<481x187xbf16, #tpu.memory_space<vmem>>, vector<32x187xbf16>,
      %c0_38 = arith.constant 0 : index
      %c8 = arith.constant 8 : index
      %41 = vector.load %arg8[%c0_38, %c8] : memref<32x201xbf16, #tpu.memory_space<vmem>>, vector<32x187xbf16>
      %c256 = arith.constant 256 : index
      %c0_39 = arith.constant 0 : index
      %42 = vector.load %arg9[%c256, %c0_39] : memref<481x187xbf16, #tpu.memory_space<vmem>>, vector<32x187xbf16>
      tpu.vector_store %arg9[%c256, %c0_39], %41 {strides = array<i32>} : memref<481x187xbf16, #tpu.memory_space<vmem>>, vector<32x187xbf16>,
      %c0_40 = arith.constant 0 : index
      %c9 = arith.constant 9 : index
      %43 = vector.load %arg8[%c0_40, %c9] : memref<32x201xbf16, #tpu.memory_space<vmem>>, vector<32x187xbf16>
      %c288 = arith.constant 288 : index
      %c0_41 = arith.constant 0 : index
      %44 = vector.load %arg9[%c288, %c0_41] : memref<481x187xbf16, #tpu.memory_space<vmem>>, vector<32x187xbf16>
      tpu.vector_store %arg9[%c288, %c0_41], %43 {strides = array<i32>} : memref<481x187xbf16, #tpu.memory_space<vmem>>, vector<32x187xbf16>,
      %c0_42 = arith.constant 0 : index
      %c10 = arith.constant 10 : index
      %45 = vector.load %arg8[%c0_42, %c10] : memref<32x201xbf16, #tpu.memory_space<vmem>>, vector<32x187xbf16>
      %c320 = arith.constant 320 : index
      %c0_43 = arith.constant 0 : index
      %46 = vector.load %arg9[%c320, %c0_43] : memref<481x187xbf16, #tpu.memory_space<vmem>>, vector<32x187xbf16>
      tpu.vector_store %arg9[%c320, %c0_43], %45 {strides = array<i32>} : memref<481x187xbf16, #tpu.memory_space<vmem>>, vector<32x187xbf16>,
      %c0_44 = arith.constant 0 : index
      %c11 = arith.constant 11 : index
      %47 = vector.load %arg8[%c0_44, %c11] : memref<32x201xbf16, #tpu.memory_space<vmem>>, vector<32x187xbf16>
      %c352 = arith.constant 352 : index
      %c0_45 = arith.constant 0 : index
      %48 = vector.load %arg9[%c352, %c0_45] : memref<481x187xbf16, #tpu.memory_space<vmem>>, vector<32x187xbf16>
      tpu.vector_store %arg9[%c352, %c0_45], %47 {strides = array<i32>} : memref<481x187xbf16, #tpu.memory_space<vmem>>, vector<32x187xbf16>,
      %c0_46 = arith.constant 0 : index
      %c12 = arith.constant 12 : index
      %49 = vector.load %arg8[%c0_46, %c12] : memref<32x201xbf16, #tpu.memory_space<vmem>>, vector<32x187xbf16>
      %c384 = arith.constant 384 : index
      %c0_47 = arith.constant 0 : index
      %50 = vector.load %arg9[%c384, %c0_47] : memref<481x187xbf16, #tpu.memory_space<vmem>>, vector<32x187xbf16>
      tpu.vector_store %arg9[%c384, %c0_47], %49 {strides = array<i32>} : memref<481x187xbf16, #tpu.memory_space<vmem>>, vector<32x187xbf16>,
      %c0_48 = arith.constant 0 : index
      %c13 = arith.constant 13 : index
      %51 = vector.load %arg8[%c0_48, %c13] : memref<32x201xbf16, #tpu.memory_space<vmem>>, vector<32x187xbf16>
      %c416 = arith.constant 416 : index
      %c0_49 = arith.constant 0 : index
      %52 = vector.load %arg9[%c416, %c0_49] : memref<481x187xbf16, #tpu.memory_space<vmem>>, vector<32x187xbf16>
      tpu.vector_store %arg9[%c416, %c0_49], %51 {strides = array<i32>} : memref<481x187xbf16, #tpu.memory_space<vmem>>, vector<32x187xbf16>,
      %c0_50 = arith.constant 0 : index
      %c14 = arith.constant 14 : index
      %53 = vector.load %arg8[%c0_50, %c14] : memref<32x201xbf16, #tpu.memory_space<vmem>>, vector<32x187xbf16>
      %c448 = arith.constant 448 : index
      %c0_51 = arith.constant 0 : index
      %54 = vector.load %arg9[%c448, %c0_51] : memref<481x187xbf16, #tpu.memory_space<vmem>>, vector<32x187xbf16>
      tpu.vector_store %arg9[%c448, %c0_51], %53 {strides = array<i32>} : memref<481x187xbf16, #tpu.memory_space<vmem>>, vector<32x187xbf16>,
      %c0_52 = arith.constant 0 : index
      %c0_53 = arith.constant 0 : index
      %55 = vector.load %arg9[%c0_52, %c0_53] : memref<481x187xbf16, #tpu.memory_space<vmem>>, vector<481x187xbf16>
      %cst_54 = arith.constant dense<0.000000e+00> : vector<32x187xf32>
      %56 = tpu.matmul %3, %55, %cst_54 {dimension_numbers = #tpu.dot_dimension_numbers<[1], [0], [0], [1], [0, 0, 1, 1], [], []>} : vector<32x481xbf16>, vector<481x187xbf16>, vector<32x187xf32> -> vector<32x187xf32>
      %cst_55 = arith.constant 0.000000e+00 : f32
      %57 = vector.broadcast %cst_55 : f32 to vector<32x187xf32>
      %58 = arith.cmpf ogt, %56, %57 : vector<32x187xf32>
      %cst_56 = arith.constant 0.000000e+00 : f32
      %59 = vector.broadcast %cst_56 : f32 to vector<32x187xf32>
      %60 = arith.minimumf %56, %59 : vector<32x187xf32>
      %61 = math.exp %60 : vector<32x187xf32>
      %cst_57 = arith.constant 1.000000e+00 : f32
      %62 = vector.broadcast %cst_57 : f32 to vector<32x187xf32>
      %63 = arith.subf %61, %62 : vector<32x187xf32>
      %64 = arith.select %58, %56, %63 : vector<32x187xi1>, vector<32x187xf32>
      %c0_58 = arith.constant 0 : index
      %c0_59 = arith.constant 0 : index
      %c0_60 = arith.constant 0 : index
      %65 = vector.load %arg5[%c0_58, %c0_59, %c0_60] : memref<2x32x187xf32, #tpu.memory_space<vmem>>, vector<2x32x187xf32>
      %66 = vector.shape_cast %64 : vector<32x187xf32> to vector<1x32x187xf32>
      %67 = vector.broadcast %66 : vector<1x32x187xf32> to vector<2x32x187xf32>
      %68 = arith.mulf %65, %67 : vector<2x32x187xf32>
      %cst_61 = arith.constant dense<0.000000e+00> : vector<2x32xf32>
      %69 = vector.multi_reduction <add>, %68, %cst_61 [2] : vector<2x32x187xf32> to vector<2x32xf32>
      %cst_62 = arith.constant dense<0.000000e+00> : vector<2xf32>
      %70 = vector.multi_reduction <add>, %69, %cst_62 [1] : vector<2x32xf32> to vector<2xf32>
      %71 = vector.shape_cast %70 : vector<2xf32> to vector<1x2xf32>
      %72 = arith.addf %71, %4 : vector<1x2xf32>
      %73 = arith.index_cast %7 : i32 to index
      %c0_63 = arith.constant 0 : index
      %c0_64 = arith.constant 0 : index
      %74 = vector.load %arg7[%73, %c0_63, %c0_64] : memref<16x1x2xf32, #tpu.memory_space<vmem>>, vector<1x1x2xf32>
      %75 = vector.shape_cast %74 : vector<1x1x2xf32> to vector<1x2xf32>
      %76 = vector.shape_cast %72 : vector<1x2xf32> to vector<1x1x2xf32>
      tpu.vector_store %arg7[%73, %c0_63, %c0_64], %76 {strides = array<i32>} : memref<16x1x2xf32, #tpu.memory_space<vmem>>, vector<1x1x2xf32>,
    }
    %c16_i32_6 = arith.constant 16 : i32
    return
  }
  func.func @transform_0(%arg0: i32) -> (i32, i32, i32) {
    %c0_i32 = arith.constant 0 : i32
    %c0_i32_0 = arith.constant 0 : i32
    %c0_i32_1 = arith.constant 0 : i32
    return %arg0, %c0_i32, %c0_i32_0 : i32, i32, i32
  }
  func.func @transform_1(%arg0: i32) -> (i32, i32) {
    %c0_i32 = arith.constant 0 : i32
    %c0_i32_0 = arith.constant 0 : i32
    %c0_i32_1 = arith.constant 0 : i32
    return %c0_i32, %c0_i32_0 : i32, i32
  }
  func.func @transform_2(%arg0: i32) -> (i32, i32) {
    %c0_i32 = arith.constant 0 : i32
    %c0_i32_0 = arith.constant 0 : i32
    %c0_i32_1 = arith.constant 0 : i32
    return %c0_i32, %c0_i32_0 : i32, i32
  }
  func.func @transform_3(%arg0: i32) -> (i32, i32) {
    %c0_i32 = arith.constant 0 : i32
    %c0_i32_0 = arith.constant 0 : i32
    %c0_i32_1 = arith.constant 0 : i32
    return %c0_i32, %c0_i32_0 : i32, i32
  }
  func.func @transform_4(%arg0: i32) -> (i32, i32, i32) {
    %c0_i32 = arith.constant 0 : i32
    %c0_i32_0 = arith.constant 0 : i32
    %c0_i32_1 = arith.constant 0 : i32
    %c0_i32_2 = arith.constant 0 : i32
    return %c0_i32, %c0_i32_0, %c0_i32_1 : i32, i32, i32
  }
  func.func @transform_5(%arg0: i32) -> (i32, i32) {
    %c0_i32 = arith.constant 0 : i32
    %c0_i32_0 = arith.constant 0 : i32
    %c0_i32_1 = arith.constant 0 : i32
    return %c0_i32, %c0_i32_0 : i32, i32
  }
  func.func @transform_6(%arg0: i32) -> (i32, i32, i32) {
    %c0_i32 = arith.constant 0 : i32
    %c0_i32_0 = arith.constant 0 : i32
    %c0_i32_1 = arith.constant 0 : i32
    return %arg0, %c0_i32, %c0_i32_0 : i32, i32, i32
  }
}

</mosaic_0001>

<bundles_post_ra>
// kernel: eegnet_forward.1
= control target key start
LH: loop header
LB: loop body
LE: loop exit
PB: predicated region body
PF: predicated region fallthrough
CT: control target
= control target key end

     0   :  { %s3869_s21 = smov 0   ;;  %s4786_s0 = inlined_call_operand.vmem [shape: bf16[32,103,750], index: 0, kind: input, shape index: {}]   ;;  %s4787_s1 = inlined_call_operand.vmem [shape: bf16[32,103], index: 1, kind: input, shape index: {}]   ;;  %s4788_s2 = inlined_call_operand.vmem [shape: bf16[750,201], index: 2, kind: input, shape index: {}]   ;;  %s4789_s3 = inlined_call_operand.vmem [shape: bf16[32,481], index: 3, kind: input, shape index: {}]   ;;  %s4790_s4 = inlined_call_operand.vmem [shape: f32[2,32,187], index: 4, kind: input, shape index: {}]   ;;  %s4791_s5 = inlined_call_operand.vmem [shape: f32[1,2], index: 5, kind: input, shape index: {}]   ;;  %s4792_s6 = inlined_call_operand.vmem [shape: f32[32,1,2], index: 6, kind: output, shape index: {}]  }
   0x1 LB: > { %s3062_s22 = sadd.s32 4294967295, %s3812_s21   ;;  %p3066_p0 = scmp.ge.s32.totalorder %s3812_s21, 1  ;;  %s3812_s21 = sphi %s3869_s21, %s16_s21  }
   0x2   : > { %p214_p1 = scmp.lt.s32.totalorder %s3812_s21, 3 }
   0x4   : > { %p215_p2 = pnand %p3066_p0, %p214_p1 }
   0x5   : > { %s3067_s23 = sshll.u32 (!%p215_p2), %s3062_s22, 4  ;;  %vm258_vm0 = vcmask (!%p215_p2), 1040384   ;;  %vm259_vm1 = vsmask.f32 (!%p215_p2), 256  ;;  %vm261_vm2 = vcmask (!%p215_p2), 479236   ;;  %v3880_v0 = vld [vmem:[%s4789_s3] sm:$0xff] (!%p215_p2) }
   0x6   : > { %218 = sbr.rel (%p215_p2) target bundleno = 1560 (0x618), region = 44  ;;  %p245_p3 = scmp.lt.s32.totalorder (!%p215_p2), %s3067_s23, 31  ;;  %vm260_vm3 = vmand (!%p215_p2), %vm258_vm0, %vm259_vm1  ;;  %vm262_vm4 = vsmask.f32 (!%p215_p2), 4352  ;;  %v265_v1 = vld [vmem:[#allocation3 + $0x1e0] sm:$0x11] (!%p215_p2) }
   0x7   : > { %v3886_v2 = vld [vmem:[%s4789_s3 + $0x8] sm:$0xff] (!%p215_p2)  ;;  %vm263_vm5 = vmand (!%p215_p2), %vm261_vm2, %vm262_vm4  ;;  %v3891_v3 = vld [vmem:[%s4787_s1] sm:$0xf] (!%p215_p2)  ;;  %s3955_s11 = smov (!%p215_p2), 0  }
   0x8   : > { %v3896_v4 = vld [vmem:[%s4787_s1 + $0x4] sm:$0xf] (!%p215_p2)  ;;  %vm264_vm6 = vmor (!%p215_p2), %vm263_vm5, %vm260_vm3  ;;  %v3903_v5 = vld [vmem:[%s4787_s1 + $0x8] sm:$0xf] (!%p215_p2) }
   0x9   : > { %v3908_v6 = vld [vmem:[%s4787_s1 + $0xc] sm:$0xf] (!%p215_p2)  ;;  %v266_v7 = vsel (!%p215_p2), %vm264_vm6, 1065369472, %v265_v1  ;;  %v3913_v8 = vld [vmem:[%s4789_s3 + $0x10] sm:$0xff] (!%p215_p2)  ;;  %v3918_v9 = vld [vmem:[%s4789_s3 + $0x18] sm:$0xff] (!%p215_p2) }
   0xa   : > { %v3923_v10 = vld [vmem:[%s4789_s3 + $0x20] sm:$0xff] (!%p215_p2)  ;;  %267 = vst [vmem:[#allocation3 + $0x1e0] sm:$0x11] (!%p215_p2), %v266_v7  ;;  %v3933_v11 = vld [vmem:[%s4789_s3 + $0x28] sm:$0xff] (!%p215_p2)  ;;  %v3938_v12 = vld [vmem:[%s4789_s3 + $0x30] sm:$0xff] (!%p215_p2) }
   0xb   : > { %v3943_v13 = vld [vmem:[%s4789_s3 + $0x38] sm:$0xff] (!%p215_p2)  ;;  %v3948_v14 = vld [vmem:[%s4791_s5] ss:$0 sm:$0xff] (!%p215_p2) }
   0xd   : > { %s4796_s23 = smov (!%p245_p3, %s3067_s23), 31 }
   0xe   : > { %s3410_s18 = smul.u32 312, %s4796_s23  ;;  %s254_s22 = scalar_lea.vmem %s4792_s6, %s4796_s23 }
  0x10   : > { %s3953_s10 = scalar_lea.vmem %s4786_s0, %s3410_s18 }
  0x11 LB: >> { %v3505_v15 = vld [vmem:[%s4788_s2 + $0x4] ss:$8 sps:$4 sm:$0xff]   ;;  %s3385_s14 = smul.u32 312, %s3816_s11  ;;  %v3818_v16 = vmov 0   ;;  %v3507_v17 = vld [vmem:[%s4788_s2] ss:$8 sps:$4 sm:$0xff]   ;;  %v4012_v45 = vcombine.low %v3891_v3, %v3896_v4  ;;  %v4040_v57 = vcombine.low %v3903_v5, %v3908_v6  ;;  %s3816_s11 = sphi %s3955_s11, %s286_s11  }
  0x12   : >> { %595 = vmatprep.mubr.bf16.mxu0 %v3818_v16  ;;  %3443 = vset.pattern.permute.xlu1 %v3818_v16  ;;  %v3508_v18 = vld [vmem:[%s4788_s2 + $0x14] ss:$8 sps:$4 sm:$0xff]   ;;  %v3510_v19 = vld [vmem:[%s4788_s2 + $0x10] ss:$8 sps:$4 sm:$0xff]   ;;  %v3511_v20 = vld [vmem:[%s4788_s2 + $0x24] ss:$8 sps:$4 sm:$0xff]  }
  0x13   : >> { %1454 = vmatprep.subr.bf16.mxu1 %v3505_v15  ;;  %3444 = vset.pattern.permute.xlu0 %v3818_v16  ;;  %s3974_s19 = scalar_lea.vmem %s3953_s10, %s3385_s14  ;;  %v3513_v25 = vld [vmem:[%s4788_s2 + $0x20] ss:$8 sps:$4 sm:$0xff]   ;;  %vm541_vm7 = vcmask 1042432   ;;  %vm542_vm8 = vcmask 1043456   ;;  %v3819_v32 = vmov 65535   ;;  %vm534_vm9 = vcmask 842752  }
  0x14   : >> { %1455 = vmatpush1.bf16.msra.mxu1 %v3507_v17  ;;  %v3445_v21 = vld [vmem:[%s3974_s19 + $0x4] ss:$24 sps:$4 sm:$0xff]   ;;  %v3447_v22 = vld [vmem:[%s3974_s19] ss:$24 sps:$4 sm:$0xff]   ;;  %v3448_v23 = vld [vmem:[%s3974_s19 + $0x34] ss:$24 sps:$4 sm:$0xff]  }
  0x15   : >> { %1456 = vmatprep.subr.bf16.mxu1 %v3508_v18  ;;  %563 = vmatprep.subr.bf16.mxu0 %v3445_v21  ;;  %v3450_v24 = vld [vmem:[%s3974_s19 + $0x30] ss:$24 sps:$4 sm:$0xff]   ;;  %v3451_v26 = vld [vmem:[%s3974_s19 + $0x64] ss:$24 sps:$4 sm:$0xff]   ;;  %v3453_v27 = vld [vmem:[%s3974_s19 + $0x60] ss:$24 sps:$4 sm:$0xff]  }
  0x16   : >> { %564 = vmatpush1.bf16.msra.mxu0 %v3447_v22  ;;  %v3454_v28 = vld [vmem:[%s3974_s19 + $0x94] ss:$24 sps:$4 sm:$0xff]   ;;  %v3456_v29 = vld [vmem:[%s3974_s19 + $0x90] ss:$24 sps:$4 sm:$0xff]   ;;  %v3457_v30 = vld [vmem:[%s3974_s19 + $0xc4] ss:$24 sps:$4 sm:$0xff]  }
  0x17   : >> { %565 = vmatprep.subr.bf16.mxu0 %v3448_v23  ;;  %v326_v31 = vld [vmem:[%s3974_s19 + $0x120] sm:$0xff]  ;;  %v543_v33 = vsel %vm541_vm7, 4294967295, %v3819_v32  ;;  %v3460_v35 = vld [vmem:[%s3974_s19 + $0xf4] ss:$24 sps:$4 sm:$0xff]   ;;  %v3462_v38 = vld [vmem:[%s3974_s19 + $0xf0] ss:$24 sps:$4 sm:$0xff]  }
  0x18   : >> { %1457 = vmatpush1.bf16.msra.mxu1 %v3510_v19  ;;  %v3459_v34 = vld [vmem:[%s3974_s19 + $0xc0] ss:$24 sps:$4 sm:$0xff]   ;;  %v3110_v36 = vcombine.high %v326_v31, %v326_v31  ;;  %v3998_v37 = vsel %vm542_vm8, %v543_v33, 0  ;;  %v3109_v39 = vcombine.low %v326_v31, %v326_v31  ;;  %v3467_v42 = vld [vmem:[%s3974_s19 + $0xc] ss:$24 sps:$4 sm:$0xff]   ;;  %s3820_s13 = smov 127  }
  0x19   : >> { %1458 = vmatprep.subr.bf16.mxu1 %v3511_v20  ;;  %v3514_v43 = vld [vmem:[%s4788_s2 + $0x34] ss:$8 sps:$4 sm:$0xff]   ;;  %v3516_v44 = vld [vmem:[%s4788_s2 + $0x30] ss:$8 sps:$4 sm:$0xff]   ;;  %v3517_v46 = vld [vmem:[%s4788_s2 + $0x44] ss:$8 sps:$4 sm:$0xff]  }
  0x1a   : >> { %566 = vmatpush1.bf16.msra.mxu0 %v3450_v24  ;;  %v549_v40 = vand.u32 %v3110_v36, %v3998_v37  ;;  %v546_v41 = vand.u32 %v3109_v39, %v3998_v37  ;;  %v3465_v47 = vld [vmem:[%s3974_s19 + $0x8] ss:$24 sps:$4 sm:$0xff]   ;;  %v3470_v48 = vld [vmem:[%s3974_s19 + $0x3c] ss:$24 sps:$4 sm:$0xff]   ;;  %v3468_v51 = vld [vmem:[%s3974_s19 + $0x38] ss:$24 sps:$4 sm:$0xff]  }
  0x1b   : >> { %567 = vmatprep.subr.bf16.mxu0 %v3451_v26  ;;  %v3519_v49 = vld [vmem:[%s4788_s2 + $0x40] ss:$8 sps:$4 sm:$0xff]   ;;  %v3520_v50 = vld [vmem:[%s4788_s2 + $0x54] ss:$8 sps:$4 sm:$0xff]   ;;  %v3473_v52 = vld [vmem:[%s3974_s19 + $0x6c] ss:$24 sps:$4 sm:$0xff]  }
  0x1c   : >> { %1459 = vmatpush1.bf16.msra.mxu1 %v3513_v25  ;;  %v3522_v53 = vld [vmem:[%s4788_s2 + $0x50] ss:$8 sps:$4 sm:$0xff]   ;;  %v3471_v54 = vld [vmem:[%s3974_s19 + $0x68] ss:$24 sps:$4 sm:$0xff]   ;;  %v3523_v55 = vld [vmem:[%s4788_s2 + $0x64] ss:$8 sps:$4 sm:$0xff]  }
  0x1d   : >> { %1460 = vmatprep.subr.bf16.mxu1 %v3514_v43  ;;  %v3476_v56 = vld [vmem:[%s3974_s19 + $0x9c] ss:$24 sps:$4 sm:$0xff]   ;;  %v3525_v58 = vld [vmem:[%s4788_s2 + $0x60] ss:$8 sps:$4 sm:$0xff]   ;;  %v3474_v60 = vld [vmem:[%s3974_s19 + $0x98] ss:$24 sps:$4 sm:$0xff]  }
  0x1e   : >> { %568 = vmatpush1.bf16.msra.mxu0 %v3453_v27  ;;  %v3526_v59 = vld [vmem:[%s4788_s2 + $0x74] ss:$8 sps:$4 sm:$0xff]   ;;  %v3479_v61 = vld [vmem:[%s3974_s19 + $0xcc] ss:$24 sps:$4 sm:$0xff]   ;;  %v3528_v62 = vld [vmem:[%s4788_s2 + $0x70] ss:$8 sps:$4 sm:$0xff]  }
  0x1f   : >> { %569 = vmatprep.subr.bf16.mxu0 %v3454_v28  ;;  %v327_v63 = vld [vmem:[%s3974_s19 + $0x128] sm:$0xff]  ;;  %v3482_v15 = vld [vmem:[%s3974_s19 + $0xfc] ss:$24 sps:$4 sm:$0xff]   ;;  %v3480_v20 = vld [vmem:[%s3974_s19 + $0xf8] ss:$24 sps:$4 sm:$0xff]   ;;  %s3821_s14 = smov 126  }
  0x20   : >> { %1461 = vmatpush1.bf16.msra.mxu1 %v3516_v44  ;;  %v3529_v1 = vld [vmem:[%s4788_s2 + $0x84] ss:$8 sps:$4 sm:$0xff]   ;;  %v3477_v7 = vld [vmem:[%s3974_s19 + $0xc8] ss:$24 sps:$4 sm:$0xff]   ;;  %v3532_v18 = vld [vmem:[%s4788_s2 + $0x94] ss:$8 sps:$4 sm:$0xff]   ;;  %v3112_v19 = vcombine.high %v327_v63, %v327_v63  ;;  %v3111_v22 = vcombine.low %v327_v63, %v327_v63 }
  0x21   : >> { %1462 = vmatprep.subr.bf16.mxu1 %v3517_v46  ;;  %v3531_v17 = vld [vmem:[%s4788_s2 + $0x80] ss:$8 sps:$4 sm:$0xff]   ;;  %v3534_v21 = vld [vmem:[%s4788_s2 + $0x90] ss:$8 sps:$4 sm:$0xff]   ;;  %v3487_v24 = vld [vmem:[%s3974_s19 + $0x14] ss:$24 sps:$4 sm:$0xff]  }
  0x22   : >> { %570 = vmatpush1.bf16.msra.mxu0 %v3456_v29  ;;  %v555_v23 = vand.u32 %v3112_v19, %v3998_v37  ;;  %v552_v25 = vand.u32 %v3111_v22, %v3998_v37  ;;  %v3485_v26 = vld [vmem:[%s3974_s19 + $0x10] ss:$24 sps:$4 sm:$0xff]   ;;  %v3490_v27 = vld [vmem:[%s3974_s19 + $0x44] ss:$24 sps:$4 sm:$0xff]   ;;  %v3488_v28 = vld [vmem:[%s3974_s19 + $0x40] ss:$24 sps:$4 sm:$0xff]  }
  0x23   : >> { %571 = vmatprep.subr.bf16.mxu0 %v3457_v30  ;;  %v3493_v29 = vld [vmem:[%s3974_s19 + $0x74] ss:$24 sps:$4 sm:$0xff]   ;;  %v3491_v30 = vld [vmem:[%s3974_s19 + $0x70] ss:$24 sps:$4 sm:$0xff]   ;;  %v3496_v31 = vld [vmem:[%s3974_s19 + $0xa4] ss:$24 sps:$4 sm:$0xff]  }
  0x24   : >> { %1463 = vmatpush1.bf16.msra.mxu1 %v3519_v49  ;;  %v3494_v32 = vld [vmem:[%s3974_s19 + $0xa0] ss:$24 sps:$4 sm:$0xff]   ;;  %v3499_v33 = vld [vmem:[%s3974_s19 + $0xd4] ss:$24 sps:$4 sm:$0xff]   ;;  %v3502_v36 = vld [vmem:[%s3974_s19 + $0x104] ss:$24 sps:$4 sm:$0xff]  }
  0x25   : >> { %1464 = vmatprep.subr.bf16.mxu1 %v3520_v50  ;;  %v3500_v39 = vld [vmem:[%s3974_s19 + $0x100] ss:$24 sps:$4 sm:$0xff]   ;;  %v3535_v43 = vld [vmem:[%s4788_s2 + $0xa4] ss:$8 sps:$4 sm:$0xff]   ;;  %s3822_s15 = smov 125   ;;  %s3823_s16 = smov 124  }
  0x26   : >> { %572 = vmatpush1.bf16.msra.mxu0 %v3459_v34  ;;  %v328_v34 = vld [vmem:[%s3974_s19 + $0x130] sm:$0xff]  ;;  %v3537_v44 = vld [vmem:[%s4788_s2 + $0xa0] ss:$8 sps:$4 sm:$0xff]   ;;  %v3541_v46 = vld [vmem:[%s4788_s2 + $0xc4] ss:$8 sps:$4 sm:$0xff]   ;;  %s3824_s17 = smov 123  }
  0x27   : >> { %573 = vmatprep.subr.bf16.mxu0 %v3460_v35  ;;  %v3497_v35 = vld [vmem:[%s3974_s19 + $0xd0] ss:$24 sps:$4 sm:$0xff]   ;;  %v3547_v50 = vld [vmem:[%s4788_s2 + $0xe4] ss:$8 sps:$4 sm:$0xff]   ;;  %s3825_s18 = smov 122   ;;  %s3826_s19 = smov 121  }
  0x28   : >> { %1465 = vmatpush1.bf16.msra.mxu1 %v3522_v53  ;;  %v3546_v49 = vld [vmem:[%s4788_s2 + $0xd0] ss:$8 sps:$4 sm:$0xff]   ;;  %s3827_s20 = smov 120   ;;  %s3828_s24 = smov 119  }
  0x29   : >> { %1466 = vmatprep.subr.bf16.mxu1 %v3523_v55  ;;  %v3552_v53 = vld [vmem:[%s4788_s2 + $0xf0] ss:$8 sps:$4 sm:$0xff]   ;;  %s3829_s25 = smov 118   ;;  %s3830_s26 = smov 117  }
  0x2a   : >> { %574 = vmatpush1.bf16.msra.mxu0 %v3462_v38  ;;  %v3114_v38 = vcombine.high %v328_v34, %v328_v34  ;;  %s3831_s27 = smov 116   ;;  %s3832_s28 = smov 115  }
  0x2b   : >> { %575 = vmatprep.subr.bf16.mxu0 %v549_v40  ;;  %v3113_v40 = vcombine.low %v328_v34, %v328_v34  ;;  %s3833_s29 = smov 114  }
  0x2c   : >> { %1467 = vmatpush1.bf16.msra.mxu1 %v3525_v58 }
  0x2d   : >> { %1468 = vmatprep.subr.bf16.mxu1 %v3526_v59 }
  0x2e   : >> { %576 = vmatpush1.bf16.msra.mxu0 %v546_v41  ;;  %v561_v41 = vand.u32 %v3114_v38, %v3998_v37 }
  0x2f   : >> { %616 = vmatprep.subr.bf16.mxu0 %v3467_v42  ;;  %v558_v42 = vand.u32 %v3113_v40, %v3998_v37  ;;  %v3538_v37 = vld [vmem:[%s4788_s2 + $0xb4] ss:$8 sps:$4 sm:$0xff]  }
  0x30   : >> { %1469 = vmatpush1.bf16.msra.mxu1 %v3528_v62 }
  0x31   : >> { %3115 = vmatmul.mubr.msk.bf16.vlgmr.msra.gmra.mrb[0].mxu0 %vm534_vm9, %v4012_v45  ;;  %1470 = vmatprep.subr.bf16.mxu1 %v3529_v1 }
  0x32   : >> { %617 = vmatpush1.bf16.msra.mxu0 %v3465_v47  ;;  %605 = vmatprep.mubr.bf16.mxu0 %v3818_v16  ;;  %v3543_v47 = vld [vmem:[%s4788_s2 + $0xc0] ss:$8 sps:$4 sm:$0xff]  }
  0x33   : >> { %618 = vmatprep.subr.bf16.mxu0 %v3470_v48  ;;  %v3544_v48 = vld [vmem:[%s4788_s2 + $0xd4] ss:$8 sps:$4 sm:$0xff]  }
  0x34   : >> { %1471 = vmatpush1.bf16.msra.mxu1 %v3531_v17 }
  0x35   : >> { %1472 = vmatprep.subr.bf16.mxu1 %v3532_v18 }
  0x36   : >> { %619 = vmatpush1.bf16.msra.mxu0 %v3468_v51  ;;  %v3549_v51 = vld [vmem:[%s4788_s2 + $0xe0] ss:$8 sps:$4 sm:$0xff]  }
  0x37   : >> { %620 = vmatprep.subr.bf16.mxu0 %v3473_v52  ;;  %v3550_v52 = vld [vmem:[%s4788_s2 + $0xf4] ss:$8 sps:$4 sm:$0xff]  }
  0x38   : >> { %1473 = vmatpush1.bf16.msra.mxu1 %v3534_v21 }
  0x39   : >> { %3116 = vmatmul.mubr.msk.bf16.gmra.mrb[4].mxu0 %vm534_vm9, %v4040_v57  ;;  %1474 = vmatprep.subr.bf16.mxu1 %v3535_v43 }
  0x3a   : >> { %621 = vmatpush1.bf16.msra.mxu0 %v3471_v54  ;;  %648 = vmatprep.mubr.bf16.mxu0 %v3818_v16  ;;  %v3555_v54 = vld [vmem:[%s4788_s2 + $0x104] ss:$8 sps:$4 sm:$0xff]  }
  0x3b   : >> { %622 = vmatprep.subr.bf16.mxu0 %v3476_v56 }
  0x3c   : >> { %1475 = vmatpush1.bf16.msra.mxu1 %v3537_v44  ;;  %v3553_v44 = vld [vmem:[%s4788_s2 + $0x100] ss:$8 sps:$4 sm:$0xff]  }
  0x3d   : >> { %1476 = vmatprep.subr.bf16.mxu1 %v3538_v37 }
  0x3e   : >> { %623 = vmatpush1.bf16.msra.mxu0 %v3474_v60 }
  0x3f   : >> { %624 = vmatprep.subr.bf16.mxu0 %v3479_v61 }
  0x42   : >> { %625 = vmatpush1.bf16.msra.mxu0 %v3477_v7 }
  0x43   : >> { %626 = vmatprep.subr.bf16.mxu0 %v3482_v15 }
  0x46   : >> { %627 = vmatpush1.bf16.msra.mxu0 %v3480_v20 }
  0x47   : >> { %628 = vmatprep.subr.bf16.mxu0 %v555_v23 }
  0x4a   : >> { %629 = vmatpush1.bf16.msra.mxu0 %v552_v25 }
  0x4b   : >> { %669 = vmatprep.subr.bf16.mxu0 %v3487_v24 }
  0x4d   : >> { %3117 = vmatmul.mubr.msk.bf16.vlgmr.msra.gmra.mrb[8].mxu0 %vm534_vm9, %v4012_v45 }
  0x4e   : >> { %670 = vmatpush1.bf16.msra.mxu0 %v3485_v26  ;;  %658 = vmatprep.mubr.bf16.mxu0 %v3818_v16 }
  0x4f   : >> { %671 = vmatprep.subr.bf16.mxu0 %v3490_v27 }
  0x52   : >> { %672 = vmatpush1.bf16.msra.mxu0 %v3488_v28 }
  0x53   : >> { %673 = vmatprep.subr.bf16.mxu0 %v3493_v29 }
  0x55   : >> { %3118 = vmatmul.mubr.msk.bf16.gmra.mrb[12].mxu0 %vm534_vm9, %v4040_v57 }
  0x56   : >> { %674 = vmatpush1.bf16.msra.mxu0 %v3491_v30  ;;  %701 = vmatprep.mubr.bf16.mxu0 %v3818_v16 }
  0x57   : >> { %675 = vmatprep.subr.bf16.mxu0 %v3496_v31 }
  0x5a   : >> { %676 = vmatpush1.bf16.msra.mxu0 %v3494_v32 }
  0x5b   : >> { %677 = vmatprep.subr.bf16.mxu0 %v3499_v33 }
  0x5e   : >> { %678 = vmatpush1.bf16.msra.mxu0 %v3497_v35 }
  0x5f   : >> { %679 = vmatprep.subr.bf16.mxu0 %v3502_v36 }
  0x62   : >> { %680 = vmatpush1.bf16.msra.mxu0 %v3500_v39 }
  0x63   : >> { %681 = vmatprep.subr.bf16.mxu0 %v561_v41 }
  0x66   : >> { %682 = vmatpush1.bf16.msra.mxu0 %v558_v42 }
  0x69   : >> { %3119 = vmatmul.mubr.msk.bf16.vlgmr.msra.gmra.mrb[16].mxu0 %vm534_vm9, %v4012_v45  ;;  %v3540_v45 = vld [vmem:[%s4788_s2 + $0xb0] ss:$8 sps:$4 sm:$0xff]  }
  0x6a   : >> { %711 = vmatprep.mubr.bf16.mxu0 %v3818_v16  ;;  %1477 = vmatpush1.bf16.msra.mxu1 %v3540_v45  ;;  %v3558_v45 = vld [vmem:[%s4788_s2 + $0x114] ss:$8 sps:$4 sm:$0xff]  }
  0x6b   : >> { %1478 = vmatprep.subr.bf16.mxu1 %v3541_v46 }
  0x6e   : >> { %1479 = vmatpush1.bf16.msra.mxu1 %v3543_v47 }
  0x6f   : >> { %1480 = vmatprep.subr.bf16.mxu1 %v3544_v48 }
  0x71   : >> { %3120 = vmatmul.mubr.msk.bf16.gmra.mrb[20].mxu0 %vm534_vm9, %v4040_v57 }
  0x72   : >> { %1481 = vmatpush1.bf16.msra.mxu1 %v3546_v49 }
  0x73   : >> { %1482 = vmatprep.subr.bf16.mxu1 %v3547_v50 }
  0x76   : >> { %1483 = vmatpush1.bf16.msra.mxu1 %v3549_v51  ;;  %v3556_v51 = vld [vmem:[%s4788_s2 + $0x110] ss:$8 sps:$4 sm:$0xff]  }
  0x77   : >> { %1484 = vmatprep.subr.bf16.mxu1 %v3550_v52 }
  0x7a   : >> { %1485 = vmatpush1.bf16.msra.mxu1 %v3552_v53 }
  0x7b   : >> { %1507 = vmatprep.subr.bf16.mxu1 %v3555_v54  ;;  %v3561_v54 = vld [vmem:[%s4788_s2 + $0x124] ss:$8 sps:$4 sm:$0xff]  }
 0x104   : >> { %v597_v55 = vpop.f32.mrb[0].mxu0 }
 0x105   : >> { %v746_v56 = vmin.f32 %v597_v55, 0.0  ;;  %v599_v57 = vpop.f32.mrb[1].mxu0  ;;  %vm722_vm10 = vcmp.gt.f32.partialorder %v597_v55, 0.0 }
 0x106   : >> { %v747_v58 = vmin.f32 %v599_v57, 0.0  ;;  %v601_v59 = vpop.f32.mrb[2].mxu0  ;;  %vm723_vm12 = vcmp.gt.f32.partialorder %v599_v57, 0.0 }
 0x107   : >> { %v770_v60 = vmul.f32 1.442695, %v746_v56  ;;  %v752_v61 = vmin.f32 %v601_v59, 0.0  ;;  %v603_v62 = vpop.f32.mrb[3].mxu0  ;;  %vm728_vm11 = vcmp.gt.f32.partialorder %v601_v59, 0.0 }
 0x108   : >> { %v772_v63 = vmul.f32 1.442695, %v747_v58  ;;  %v753_v1 = vmin.f32 %v603_v62, 0.0  ;;  %vm729_vm13 = vcmp.gt.f32.partialorder %v603_v62, 0.0 }
 0x109   : >> { %3738 = vpow2.f32 %v770_v60  ;;  %v782_v7 = vmul.f32 1.442695, %v752_v61 }
 0x10a   : >> { %3740 = vpow2.f32 %v772_v63  ;;  %v784_v15 = vmul.f32 1.442695, %v753_v1  ;;  %v3559_v63 = vld [vmem:[%s4788_s2 + $0x120] ss:$8 sps:$4 sm:$0xff]  }
 0x10b   : >> { %3742 = vpow2.f32 %v782_v7 }
 0x10c   : >> { %3744 = vpow2.f32 %v784_v15  ;;  %v607_v17 = vpop.f32.mrb[4].mxu0 }
 0x10d   : >> { %v758_v18 = vmin.f32 %v607_v17, 0.0  ;;  %v609_v19 = vpop.f32.mrb[5].mxu0  ;;  %vm734_vm14 = vcmp.gt.f32.partialorder %v607_v17, 0.0 }
 0x10e   : >> { %v759_v20 = vmin.f32 %v609_v19, 0.0  ;;  %v611_v21 = vpop.f32.mrb[6].mxu0  ;;  %vm735_vm15 = vcmp.gt.f32.partialorder %v609_v19, 0.0 }
 0x10f   : >> { %v794_v22 = vmul.f32 1.442695, %v758_v18  ;;  %v764_v23 = vmin.f32 %v611_v21, 0.0  ;;  %v613_v24 = vpop.f32.mrb[7].mxu0  ;;  %vm740_vm1 = vcmp.gt.f32.partialorder %v611_v21, 0.0 }
 0x110   : >> { %v796_v25 = vmul.f32 1.442695, %v759_v20  ;;  %v765_v26 = vmin.f32 %v613_v24, 0.0  ;;  %vm741_vm2 = vcmp.gt.f32.partialorder %v613_v24, 0.0 }
 0x111   : >> { %3746 = vpow2.f32 %v794_v22  ;;  %v806_v27 = vmul.f32 1.442695, %v764_v23 }
 0x112   : >> { %3748 = vpow2.f32 %v796_v25  ;;  %v808_v28 = vmul.f32 1.442695, %v765_v26  ;;  %v3567_v26 = vld [vmem:[%s4788_s2 + $0x144] ss:$8 sps:$4 sm:$0xff]  }
 0x113   : >> { %v3739_v29 = vpop.eup %3738  ;;  %3750 = vpow2.f32 %v806_v27 }
 0x114   : >> { %v3741_v30 = vpop.eup %3740  ;;  %v3121_v31 = vadd.f32 -1.0, %v3739_v29  ;;  %3752 = vpow2.f32 %v808_v28 }
 0x115   : >> { %v3743_v32 = vpop.eup %3742  ;;  %v3122_v33 = vadd.f32 -1.0, %v3741_v30  ;;  %v3565_v30 = vld [vmem:[%s4788_s2 + $0x140] ss:$8 sps:$4 sm:$0xff]  }
 0x116   : >> { %v3745_v34 = vpop.eup %3744  ;;  %v3127_v35 = vadd.f32 -1.0, %v3743_v32  ;;  %v842_v38 = vsel %vm722_vm10, %v597_v55, %v3121_v31 }
 0x117   : >> { %v3128_v36 = vadd.f32 -1.0, %v3745_v34  ;;  %v843_v40 = vsel %vm723_vm12, %v599_v57, %v3122_v33  ;;  %v3570_v33 = vld [vmem:[%s4788_s2 + $0x154] ss:$8 sps:$4 sm:$0xff]  }
 0x118   : >> { %v848_v39 = vsel %vm728_vm11, %v601_v59, %v3127_v35 }
 0x119   : >> { %v849_v41 = vsel %vm729_vm13, %v603_v62, %v3128_v36  ;;  %v866_v42 = vpack.c.bf16 %v848_v39, %v842_v38 }
 0x11a   : >> { %v867_v43 = vpack.c.bf16 %v849_v41, %v843_v40  ;;  %v3568_v41 = vld [vmem:[%s4788_s2 + $0x150] ss:$8 sps:$4 sm:$0xff]  }
 0x11b   : >> { %v3747_v37 = vpop.eup %3746 }
 0x11c   : >> { %v3749_v46 = vpop.eup %3748  ;;  %1486 = vmatprep.mubr.bf16.mxu1 %v867_v43  ;;  %v3133_v47 = vadd.f32 -1.0, %v3747_v37 }
 0x11d   : >> { %v3751_v48 = vpop.eup %3750  ;;  %1487 = vmatmul.mubr.bf16.vlgmr.msra.gmra.mrb[0].mxu1 %v866_v42  ;;  %v3134_v49 = vadd.f32 -1.0, %v3749_v46 }
 0x11e   : >> { %v3753_v50 = vpop.eup %3752  ;;  %1508 = vmatpush1.bf16.msra.mxu1 %v3553_v44  ;;  %v854_v52 = vsel %vm734_vm14, %v607_v17, %v3133_v47  ;;  %v3139_v53 = vadd.f32 -1.0, %v3751_v48  ;;  %v3564_v17 = vld [vmem:[%s4788_s2 + $0x134] ss:$8 sps:$4 sm:$0xff]   ;;  %v3573_v44 = vld [vmem:[%s4788_s2 + $0x164] ss:$8 sps:$4 sm:$0xff]  }
 0x11f   : >> { %1509 = vmatprep.subr.bf16.mxu1 %v3558_v45  ;;  %v855_v55 = vsel %vm735_vm15, %v609_v19, %v3134_v49  ;;  %v3140_v56 = vadd.f32 -1.0, %v3753_v50 }
 0x120   : >> { %v860_v57 = vsel %vm740_vm1, %v611_v21, %v3139_v53  ;;  %v4151_v58 = vpop.f32.mrb[8].mxu0 }
 0x121   : >> { %v861_v59 = vsel %vm741_vm2, %v613_v24, %v3140_v56  ;;  %v748_v60 = vmin.f32 %v4151_v58, 0.0  ;;  %v4154_v61 = vpop.f32.mrb[9].mxu0  ;;  %v872_v62 = vpack.c.bf16 %v860_v57, %v854_v52  ;;  %v3562_v24 = vld [vmem:[%s4788_s2 + $0x130] ss:$8 sps:$4 sm:$0xff]   ;;  %vm724_vm3 = vcmp.gt.f32.partialorder %v4151_v58, 0.0 }
 0x122   : >> { %1510 = vmatpush1.bf16.msra.mxu1 %v3556_v51  ;;  %v749_v1 = vmin.f32 %v4154_v61, 0.0  ;;  %v4160_v7 = vpop.f32.mrb[10].mxu0  ;;  %v873_v15 = vpack.c.bf16 %v861_v59, %v855_v55  ;;  %vm725_vm4 = vcmp.gt.f32.partialorder %v4154_v61, 0.0  ;;  %v3571_v51 = vld [vmem:[%s4788_s2 + $0x160] ss:$8 sps:$4 sm:$0xff]  }
 0x123   : >> { %1511 = vmatprep.subr.bf16.mxu1 %v3561_v54  ;;  %v774_v18 = vmul.f32 1.442695, %v748_v60  ;;  %v754_v19 = vmin.f32 %v4160_v7, 0.0  ;;  %v656_v20 = vpop.f32.mrb[11].mxu0  ;;  %vm730_vm5 = vcmp.gt.f32.partialorder %v4160_v7, 0.0 }
 0x124   : >> { %v776_v21 = vmul.f32 1.442695, %v749_v1  ;;  %v755_v22 = vmin.f32 %v656_v20, 0.0  ;;  %1496 = vmatprep.mubr.bf16.mxu1 %v873_v15  ;;  %vm731_vm6 = vcmp.gt.f32.partialorder %v656_v20, 0.0  ;;  %v3576_v54 = vld [vmem:[%s4788_s2 + $0x174] ss:$8 sps:$4 sm:$0xff]  }
 0x125   : >> { %3754 = vpow2.f32 %v774_v18  ;;  %v786_v23 = vmul.f32 1.442695, %v754_v19  ;;  %1497 = vmatmul.mubr.bf16.gmra.mrb[4].mxu1 %v872_v62 }
 0x126   : >> { %1512 = vmatpush1.bf16.msra.mxu1 %v3559_v63  ;;  %3756 = vpow2.f32 %v776_v21  ;;  %v788_v25 = vmul.f32 1.442695, %v755_v22 }
 0x127   : >> { %1513 = vmatprep.subr.bf16.mxu1 %v3564_v17  ;;  %3758 = vpow2.f32 %v786_v23  ;;  %v3577_v17 = vld [vmem:[%s4788_s2 + $0x180] ss:$8 sps:$4 sm:$0xff]  }
 0x128   : >> { %3760 = vpow2.f32 %v788_v25  ;;  %v4172_v27 = vpop.f32.mrb[12].mxu0 }
 0x129   : >> { %v760_v28 = vmin.f32 %v4172_v27, 0.0  ;;  %v4175_v29 = vpop.f32.mrb[13].mxu0  ;;  %vm736_vm7 = vcmp.gt.f32.partialorder %v4172_v27, 0.0 }
 0x12a   : >> { %1514 = vmatpush1.bf16.msra.mxu1 %v3562_v24  ;;  %v761_v31 = vmin.f32 %v4175_v29, 0.0  ;;  %v4181_v32 = vpop.f32.mrb[14].mxu0  ;;  %vm737_vm9 = vcmp.gt.f32.partialorder %v4175_v29, 0.0 }
 0x12b   : >> { %1515 = vmatprep.subr.bf16.mxu1 %v3567_v26  ;;  %v798_v34 = vmul.f32 1.442695, %v760_v28  ;;  %v766_v35 = vmin.f32 %v4181_v32, 0.0  ;;  %v666_v36 = vpop.f32.mrb[15].mxu0  ;;  %vm742_vm10 = vcmp.gt.f32.partialorder %v4181_v32, 0.0 }
 0x12c   : >> { %v800_v38 = vmul.f32 1.442695, %v761_v31  ;;  %v767_v39 = vmin.f32 %v666_v36, 0.0  ;;  %vm743_vm11 = vcmp.gt.f32.partialorder %v666_v36, 0.0 }
 0x12d   : >> { %3762 = vpow2.f32 %v798_v34  ;;  %v810_v40 = vmul.f32 1.442695, %v766_v35 }
 0x12e   : >> { %1516 = vmatpush1.bf16.msra.mxu1 %v3565_v30  ;;  %3764 = vpow2.f32 %v800_v38  ;;  %v812_v42 = vmul.f32 1.442695, %v767_v39 }
 0x12f   : >> { %v3755_v43 = vpop.eup %3754  ;;  %1517 = vmatprep.subr.bf16.mxu1 %v3570_v33  ;;  %3766 = vpow2.f32 %v810_v40  ;;  %v3585_v33 = vld [vmem:[%s4788_s2 + $0x1a4] ss:$8 sps:$4 sm:$0xff]  }
 0x130   : >> { %v3757_v37 = vpop.eup %3756  ;;  %v3123_v45 = vadd.f32 -1.0, %v3755_v43  ;;  %3768 = vpow2.f32 %v812_v42  ;;  %v3588_v43 = vld [vmem:[%s4788_s2 + $0x1b4] ss:$8 sps:$4 sm:$0xff]  }
 0x131   : >> { %v3759_v46 = vpop.eup %3758  ;;  %v3124_v47 = vadd.f32 -1.0, %v3757_v37 }
 0x132   : >> { %v3761_v48 = vpop.eup %3760  ;;  %v4197_v49 = vsel %vm724_vm3, %v4151_v58, %v3123_v45  ;;  %1518 = vmatpush1.bf16.msra.mxu1 %v3568_v41  ;;  %v3129_v50 = vadd.f32 -1.0, %v3759_v46  ;;  %v3574_v58 = vld [vmem:[%s4788_s2 + $0x170] ss:$8 sps:$4 sm:$0xff]   ;;  %v3583_v41 = vld [vmem:[%s4788_s2 + $0x1a0] ss:$8 sps:$4 sm:$0xff]  }
 0x133   : >> { %v845_v52 = vsel %vm725_vm4, %v4154_v61, %v3124_v47  ;;  %v3130_v53 = vadd.f32 -1.0, %v3761_v48  ;;  %1519 = vmatprep.subr.bf16.mxu1 %v3573_v44  ;;  %v3579_v61 = vld [vmem:[%s4788_s2 + $0x184] ss:$8 sps:$4 sm:$0xff]   ;;  %v3586_v46 = vld [vmem:[%s4788_s2 + $0x1b0] ss:$8 sps:$4 sm:$0xff]  }
 0x134   : >> { %v4207_v55 = vsel %vm730_vm5, %v4160_v7, %v3129_v50  ;;  %v3591_v50 = vld [vmem:[%s4788_s2 + $0x1c4] ss:$8 sps:$4 sm:$0xff]   ;;  %vm1440_vm5 = vcmask 900096  }
 0x135   : >> { %v868_v56 = vpack.c.bf16 %v4207_v55, %v4197_v49  ;;  %v851_v57 = vsel %vm731_vm6, %v656_v20, %v3130_v53  ;;  %v3582_v20 = vld [vmem:[%s4788_s2 + $0x194] ss:$8 sps:$4 sm:$0xff]   ;;  %v3607_v49 = vld [vmem:[%s4788_s2 + $0x220] ss:$8 sps:$4 sm:$0xff]   ;;  %vm1447_vm6 = vcmask 1046528  }
 0x136   : >> { %1520 = vmatpush1.bf16.msra.mxu1 %v3571_v51  ;;  %v869_v59 = vpack.c.bf16 %v851_v57, %v845_v52  ;;  %v3612_v55 = vld [vmem:[%s4788_s2 + $0x234] ss:$8 sps:$4 sm:$0xff]  }
 0x137   : >> { %v3763_v60 = vpop.eup %3762  ;;  %1521 = vmatprep.subr.bf16.mxu1 %v3576_v54 }
 0x138   : >> { %v3765_v62 = vpop.eup %3764  ;;  %1539 = vmatprep.mubr.bf16.mxu1 %v869_v59  ;;  %v3135_v63 = vadd.f32 -1.0, %v3763_v60  ;;  %v3589_v59 = vld [vmem:[%s4788_s2 + $0x1c0] ss:$8 sps:$4 sm:$0xff]  }
 0x139   : >> { %v3767_v1 = vpop.eup %3766  ;;  %v3136_v7 = vadd.f32 -1.0, %v3765_v62  ;;  %v3594_v62 = vld [vmem:[%s4788_s2 + $0x1d4] ss:$8 sps:$4 sm:$0xff]  }
 0x13a   : >> { %v3769_v15 = vpop.eup %3768  ;;  %1522 = vmatpush1.bf16.msra.mxu1 %v3574_v58  ;;  %v4224_v18 = vsel %vm736_vm7, %v4172_v27, %v3135_v63  ;;  %v3141_v19 = vadd.f32 -1.0, %v3767_v1  ;;  %vm1618_vm7 = vcmask 596992  }
 0x13b   : >> { %1523 = vmatprep.subr.bf16.mxu1 %v3579_v61  ;;  %v4230_v21 = vsel %vm737_vm9, %v4175_v29, %v3136_v7  ;;  %v3142_v22 = vadd.f32 -1.0, %v3769_v15  ;;  %v3580_v29 = vld [vmem:[%s4788_s2 + $0x190] ss:$8 sps:$4 sm:$0xff]   ;;  %vm1646_vm9 = vcmask 482308  }
 0x13c   : >> { %v4233_v23 = vsel %vm742_vm10, %v4181_v32, %v3141_v19  ;;  %v4235_v24 = vpop.f32.mrb[16].mxu0  ;;  %v3592_v19 = vld [vmem:[%s4788_s2 + $0x1d0] ss:$8 sps:$4 sm:$0xff]   ;;  %vm4429_vm10 = vmor %vm1646_vm9, %vm542_vm8  ;;  %vm1684_vm8 = vcmask 1039360   ;;  %vm2224_vm9 = vcmask 941056  }
 0x13d   : >> { %v4237_v25 = vsel %vm743_vm11, %v666_v36, %v3142_v22  ;;  %v750_v26 = vmin.f32 %v4235_v24, 0.0  ;;  %v4240_v27 = vpop.f32.mrb[17].mxu0  ;;  %v874_v28 = vpack.c.bf16 %v4233_v23, %v4224_v18  ;;  %vm726_vm12 = vcmp.gt.f32.partialorder %v4235_v24, 0.0  ;;  %v3618_v18 = vld [vmem:[%s4788_s2 + $0x254] ss:$8 sps:$4 sm:$0xff]  }
 0x13e   : >> { %1524 = vmatpush1.bf16.msra.mxu1 %v3577_v17  ;;  %v751_v30 = vmin.f32 %v4240_v27, 0.0  ;;  %v707_v31 = vpop.f32.mrb[18].mxu0  ;;  %v875_v32 = vpack.c.bf16 %v4237_v25, %v4230_v21  ;;  %vm727_vm13 = vcmp.gt.f32.partialorder %v4240_v27, 0.0  ;;  %v3615_v21 = vld [vmem:[%s4788_s2 + $0x244] ss:$8 sps:$4 sm:$0xff]   ;;  %vm1729_vm11 = vcmask 1031168  }
 0x13f   : >> { %1525 = vmatprep.subr.bf16.mxu1 %v3582_v20  ;;  %v778_v34 = vmul.f32 1.442695, %v750_v26  ;;  %v756_v35 = vmin.f32 %v707_v31, 0.0  ;;  %v709_v36 = vpop.f32.mrb[19].mxu0  ;;  %vm732_vm14 = vcmp.gt.f32.partialorder %v707_v31, 0.0 }
 0x140   : >> { %v780_v38 = vmul.f32 1.442695, %v751_v30  ;;  %v757_v39 = vmin.f32 %v709_v36, 0.0  ;;  %vm733_vm15 = vcmp.gt.f32.partialorder %v709_v36, 0.0  ;;  %v3597_v26 = vld [vmem:[%s4788_s2 + $0x1e4] ss:$8 sps:$4 sm:$0xff]  }
 0x141   : >> { %3770 = vpow2.f32 %v778_v34  ;;  %v790_v40 = vmul.f32 1.442695, %v756_v35  ;;  %v3613_v25 = vld [vmem:[%s4788_s2 + $0x240] ss:$8 sps:$4 sm:$0xff]   ;;  %v3616_v23 = vld [vmem:[%s4788_s2 + $0x250] ss:$8 sps:$4 sm:$0xff]  }
 0x142   : >> { %1526 = vmatpush1.bf16.msra.mxu1 %v3580_v29  ;;  %3772 = vpow2.f32 %v780_v38  ;;  %v792_v42 = vmul.f32 1.442695, %v757_v39 }
 0x143   : >> { %1527 = vmatprep.subr.bf16.mxu1 %v3585_v33  ;;  %3774 = vpow2.f32 %v790_v40  ;;  %v3600_v40 = vld [vmem:[%s4788_s2 + $0x1f4] ss:$8 sps:$4 sm:$0xff]  }
 0x144   : >> { %3776 = vpow2.f32 %v792_v42  ;;  %v713_v44 = vpop.f32.mrb[20].mxu0 }
 0x145   : >> { %v762_v37 = vmin.f32 %v713_v44, 0.0  ;;  %v4259_v45 = vpop.f32.mrb[21].mxu0  ;;  %vm738_vm1 = vcmp.gt.f32.partialorder %v713_v44, 0.0 }
 0x146   : >> { %1528 = vmatpush1.bf16.msra.mxu1 %v3583_v41  ;;  %v763_v47 = vmin.f32 %v4259_v45, 0.0  ;;  %v4265_v48 = vpop.f32.mrb[22].mxu0  ;;  %vm739_vm2 = vcmp.gt.f32.partialorder %v4259_v45, 0.0 }
 0x147   : >> { %1529 = vmatprep.subr.bf16.mxu1 %v3588_v43  ;;  %v802_v51 = vmul.f32 1.442695, %v762_v37  ;;  %v768_v52 = vmin.f32 %v4265_v48, 0.0  ;;  %v719_v53 = vpop.f32.mrb[23].mxu0  ;;  %vm744_vm3 = vcmp.gt.f32.partialorder %v4265_v48, 0.0 }
 0x148   : >> { %v804_v54 = vmul.f32 1.442695, %v763_v47  ;;  %v769_v57 = vmin.f32 %v719_v53, 0.0  ;;  %v3598_v43 = vld [vmem:[%s4788_s2 + $0x1f0] ss:$8 sps:$4 sm:$0xff]   ;;  %vm745_vm4 = vcmp.gt.f32.partialorder %v719_v53, 0.0 }
 0x149   : >> { %3778 = vpow2.f32 %v802_v51  ;;  %v814_v58 = vmul.f32 1.442695, %v768_v52  ;;  %v3603_v47 = vld [vmem:[%s4788_s2 + $0x204] ss:$8 sps:$4 sm:$0xff]  }
 0x14a   : >> { %1530 = vmatpush1.bf16.msra.mxu1 %v3586_v46  ;;  %3780 = vpow2.f32 %v804_v54  ;;  %v816_v60 = vmul.f32 1.442695, %v769_v57  ;;  %v3601_v57 = vld [vmem:[%s4788_s2 + $0x200] ss:$8 sps:$4 sm:$0xff]  }
 0x14b   : >> { %v3771_v61 = vpop.eup %3770  ;;  %1531 = vmatprep.subr.bf16.mxu1 %v3591_v50  ;;  %3782 = vpow2.f32 %v814_v58 }
 0x14c   : >> { %v3773_v63 = vpop.eup %3772  ;;  %v3125_v1 = vadd.f32 -1.0, %v3771_v61  ;;  %3784 = vpow2.f32 %v816_v60  ;;  %v3622_v60 = vld [vmem:[%s4788_s2 + $0x270] ss:$8 sps:$4 sm:$0xff]   ;;  %v3627_v61 = vld [vmem:[%s4788_s2 + $0x284] ss:$8 sps:$4 sm:$0xff]  }
 0x14d   : >> { %v3775_v7 = vpop.eup %3774  ;;  %v3126_v15 = vadd.f32 -1.0, %v3773_v63  ;;  %v3630_v63 = vld [vmem:[%s4788_s2 + $0x294] ss:$8 sps:$4 sm:$0xff]  }
 0x14e   : >> { %v3777_v17 = vpop.eup %3776  ;;  %1532 = vmatpush1.bf16.msra.mxu1 %v3589_v59  ;;  %v4283_v20 = vsel %vm726_vm12, %v4235_v24, %v3125_v1  ;;  %v3131_v22 = vadd.f32 -1.0, %v3775_v7  ;;  %v3595_v24 = vld [vmem:[%s4788_s2 + $0x1e0] ss:$8 sps:$4 sm:$0xff]   ;;  %v3624_v59 = vld [vmem:[%s4788_s2 + $0x274] ss:$8 sps:$4 sm:$0xff]   ;;  %vm1774_vm12 = vcmask 1022976  }
 0x14f   : >> { %1533 = vmatprep.subr.bf16.mxu1 %v3594_v62  ;;  %v847_v29 = vsel %vm727_vm13, %v4240_v27, %v3126_v15  ;;  %v3132_v30 = vadd.f32 -1.0, %v3777_v17  ;;  %v3625_v62 = vld [vmem:[%s4788_s2 + $0x280] ss:$8 sps:$4 sm:$0xff]   ;;  %v3628_v1 = vld [vmem:[%s4788_s2 + $0x290] ss:$8 sps:$4 sm:$0xff]   ;;  %vm1819_vm13 = vcmask 1014784  }
 0x150   : >> { %v4289_v33 = vsel %vm732_vm14, %v707_v31, %v3131_v22  ;;  %v3633_v7 = vld [vmem:[%s4788_s2 + $0x2a4] ss:$8 sps:$4 sm:$0xff]   ;;  %v3631_v15 = vld [vmem:[%s4788_s2 + $0x2a0] ss:$8 sps:$4 sm:$0xff]   ;;  %v3636_v17 = vld [vmem:[%s4788_s2 + $0x2b4] ss:$8 sps:$4 sm:$0xff]  }
 0x151   : >> { %v870_v34 = vpack.c.bf16 %v4289_v33, %v4283_v20  ;;  %v853_v35 = vsel %vm733_vm15, %v709_v36, %v3132_v30  ;;  %v3639_v22 = vld [vmem:[%s4788_s2 + $0x2c4] ss:$8 sps:$4 sm:$0xff]   ;;  %v3640_v30 = vld [vmem:[%s4788_s2 + $0x2d0] ss:$8 sps:$4 sm:$0xff]   ;;  %vm1864_vm14 = vcmask 1006592   ;;  %vm1909_vm15 = vcmask 998400  }
 0x152   : >> { %1534 = vmatpush1.bf16.msra.mxu1 %v3592_v19  ;;  %v871_v38 = vpack.c.bf16 %v853_v35, %v847_v29  ;;  %v3634_v19 = vld [vmem:[%s4788_s2 + $0x2b0] ss:$8 sps:$4 sm:$0xff]   ;;  %v3642_v29 = vld [vmem:[%s4788_s2 + $0x2d4] ss:$8 sps:$4 sm:$0xff]  }
 0x153   : >> { %v3779_v39 = vpop.eup %3778  ;;  %1535 = vmatprep.subr.bf16.mxu1 %v3597_v26  ;;  %v3637_v26 = vld [vmem:[%s4788_s2 + $0x2c0] ss:$8 sps:$4 sm:$0xff]   ;;  %v3643_v35 = vld [vmem:[%s4788_s2 + $0x2e4] ss:$8 sps:$4 sm:$0x7f]  }
 0x154   : >> { %v3781_v27 = vpop.eup %3780  ;;  %v3137_v31 = vadd.f32 -1.0, %v3779_v39 }
 0x155   : >> { %v3783_v41 = vpop.eup %3782  ;;  %v3138_v42 = vadd.f32 -1.0, %v3781_v27 }
 0x156   : >> { %v3785_v36 = vpop.eup %3784  ;;  %1536 = vmatpush1.bf16.msra.mxu1 %v3595_v24  ;;  %v4304_v37 = vsel %vm738_vm1, %v713_v44, %v3137_v31  ;;  %v3143_v46 = vadd.f32 -1.0, %v3783_v41  ;;  %v3645_v24 = vld [vmem:[%s4788_s2 + $0x2e0] ss:$8 sps:$4 sm:$0x7f]   ;;  %vm1954_vm1 = vcmask 990208  }
 0x157   : >> { %1537 = vmatprep.subr.bf16.mxu1 %v3600_v40  ;;  %v4310_v50 = vsel %vm739_vm2, %v4259_v45, %v3138_v42  ;;  %v3144_v51 = vadd.f32 -1.0, %v3785_v36  ;;  %v3606_v45 = vld [vmem:[%s4788_s2 + $0x214] ss:$8 sps:$4 sm:$0xff]   ;;  %vm1999_vm2 = vcmask 982016  }
 0x158   : >> { %v4313_v52 = vsel %vm744_vm3, %v4265_v48, %v3143_v46  ;;  %v3604_v48 = vld [vmem:[%s4788_s2 + $0x210] ss:$8 sps:$4 sm:$0xff]   ;;  %vm2044_vm3 = vcmask 973824  }
 0x159   : >> { %v4315_v54 = vsel %vm745_vm4, %v719_v53, %v3144_v51  ;;  %v876_v44 = vpack.c.bf16 %v4313_v52, %v4304_v37  ;;  %v3609_v53 = vld [vmem:[%s4788_s2 + $0x224] ss:$8 sps:$4 sm:$0xff]   ;;  %vm2089_vm4 = vcmask 965632  }
 0x15a   : >> { %1538 = vmatpush1.bf16.msra.mxu1 %v3598_v43  ;;  %v877_v58 = vpack.c.bf16 %v4315_v54, %v4310_v50 }
 0x15b   : >> { %1560 = vmatprep.subr.bf16.mxu1 %v3603_v47  ;;  %v3304_v47 = vcombine.low %v3886_v2, %v3918_v9 }
 0x15d   : >> { %1540 = vmatmul.mubr.bf16.vlgmr.msra.gmra.mrb[0].mxu1 %v868_v56  ;;  %v3610_v56 = vld [vmem:[%s4788_s2 + $0x230] ss:$8 sps:$4 sm:$0xff]  }
 0x15e   : >> { %1561 = vmatpush1.bf16.msra.mxu1 %v3601_v57  ;;  %1549 = vmatprep.mubr.bf16.mxu1 %v875_v32  ;;  %v3619_v32 = vld [vmem:[%s4788_s2 + $0x260] ss:$8 sps:$4 sm:$0xff]  }
 0x15f   : >> { %1562 = vmatprep.subr.bf16.mxu1 %v3606_v45 }
 0x162   : >> { %1563 = vmatpush1.bf16.msra.mxu1 %v3604_v48 }
 0x163   : >> { %1564 = vmatprep.subr.bf16.mxu1 %v3609_v53  ;;  %v3303_v53 = vcombine.high %v3880_v0, %v3913_v8 }
 0x165   : >> { %1550 = vmatmul.mubr.bf16.gmra.mrb[4].mxu1 %v874_v28  ;;  %v3621_v28 = vld [vmem:[%s4788_s2 + $0x264] ss:$8 sps:$4 sm:$0xff]   ;;  %2734 = vmatprep.mubr.bf16.mxu0 %v3303_v53 }
 0x166   : >> { %1565 = vmatpush1.bf16.msra.mxu1 %v3607_v49  ;;  %3240 = vmatprep.mubr.msk.bf16.mxu1 %vm1440_vm5, %v871_v38  ;;  %v1449_v38 = vsel %vm1447_vm6, %v3645_v24, 0 }
 0x167   : >> { %1566 = vmatprep.subr.bf16.mxu1 %v3612_v55 }
 0x16a   : >> { %1567 = vmatpush1.bf16.msra.mxu1 %v3610_v56 }
 0x16b   : >> { %1568 = vmatprep.subr.bf16.mxu1 %v3615_v21 }
 0x16e   : >> { %1569 = vmatpush1.bf16.msra.mxu1 %v3613_v25 }
 0x16f   : >> { %1570 = vmatprep.subr.bf16.mxu1 %v3618_v18 }
 0x172   : >> { %1571 = vmatpush1.bf16.msra.mxu1 %v3616_v23 }
 0x173   : >> { %1572 = vmatprep.subr.bf16.mxu1 %v3621_v28 }
 0x176   : >> { %1573 = vmatpush1.bf16.msra.mxu1 %v3619_v32 }
 0x177   : >> { %1574 = vmatprep.subr.bf16.mxu1 %v3624_v59 }
 0x17a   : >> { %1575 = vmatpush1.bf16.msra.mxu1 %v3622_v60 }
 0x17b   : >> { %1576 = vmatprep.subr.bf16.mxu1 %v3627_v61 }
 0x17e   : >> { %1577 = vmatpush1.bf16.msra.mxu1 %v3625_v62 }
 0x17f   : >> { %1578 = vmatprep.subr.bf16.mxu1 %v3630_v63 }
 0x182   : >> { %1579 = vmatpush1.bf16.msra.mxu1 %v3628_v1 }
 0x183   : >> { %1580 = vmatprep.subr.bf16.mxu1 %v3633_v7 }
 0x186   : >> { %1581 = vmatpush1.bf16.msra.mxu1 %v3631_v15 }
 0x187   : >> { %1582 = vmatprep.subr.bf16.mxu1 %v3636_v17 }
 0x18a   : >> { %1583 = vmatpush1.bf16.msra.mxu1 %v3634_v19 }
 0x18b   : >> { %1584 = vmatprep.subr.bf16.mxu1 %v3639_v22 }
 0x18e   : >> { %1585 = vmatpush1.bf16.msra.mxu1 %v3637_v26 }
 0x18f   : >> { %1586 = vmatprep.subr.bf16.mxu1 %v3642_v29 }
 0x192   : >> { %1587 = vmatpush1.bf16.msra.mxu1 %v3640_v30 }
 0x193   : >> { %3239 = vmatprep.subr.msk.bf16.mxu1 %vm1447_vm6, %v3643_v35  ;;  %vm2686_vm6 = vcmask 793600  }
 0x196   : >> { %1589 = vmatpush1.bf16.msra.mxu1 %v1449_v38 }
 0x199   : >> { %1593 = vmatmul.mubr.bf16.vlgmr.msra.gmra.mrb[0].mxu1 %v870_v34 }
 0x19a   : >> { %3241 = vmatprep.mubr.msk.bf16.mxu1 %vm1440_vm5, %v877_v58  ;;  %vm2134_vm5 = vcmask 957440  }
 0x1a1   : >> { %1603 = vmatmul.mubr.bf16.gmra.mrb[4].mxu1 %v876_v44 }
 0x26c   : >> { %v1594_v39 = vpop.f32.mrb[0].mxu1 }
 0x26d   : >> { %v1596_v40 = vpop.f32.mrb[1].mxu1 }
 0x26e   : >> { %v1598_v27 = vpop.f32.mrb[2].mxu1 }
 0x26f   : >> { %v1613_v31 = vpack.c.bf16 %v1598_v27, %v1594_v39  ;;  %v1600_v41 = vpop.f32.mrb[3].mxu1 }
 0x270   : >> { %v1614_v42 = vpack.c.bf16 %v1600_v41, %v1596_v40 }
 0x272   : >> { %1619 = vst.msk [vmem:[#allocation2 + $0x8] sm:$0xff] %vm1618_vm7, %v1614_v42 }
 0x274   : >> { %v1604_v36 = vpop.f32.mrb[4].mxu1 }
 0x275   : >> { %v1606_v20 = vpop.f32.mrb[5].mxu1 }
 0x276   : >> { %v1608_v33 = vpop.f32.mrb[6].mxu1 }
 0x277   : >> { %v1615_v34 = vpack.c.bf16 %v1608_v33, %v1604_v36  ;;  %v1610_v43 = vpop.f32.mrb[7].mxu1 }
 0x278   : >> { %v1616_v46 = vpack.c.bf16 %v1610_v43, %v1606_v20 }
 0x279   : >> { %v1623_v37 = vld [vmem:[#allocation2 + $0x8] sm:$0xff] }
 0x27a   : >> { %v4433_v50 = vcombine.low %v1613_v31, %v1623_v37  ;;  %v4435_v51 = vcombine.high %v1613_v31, %v1623_v37  ;;  %1621 = vst.msk [vmem:[#allocation2 + $0x18] sm:$0xff] %vm1618_vm7, %v1616_v46  ;;  %vm2179_vm7 = vcmask 949248  }
 0x27c   : >> { %1648 = vst.msk [vmem:[#allocation3] sm:$0xff] %vm4429_vm10, %v4433_v50  ;;  %1649 = vst.msk [vmem:[#allocation3 + $0x8] sm:$0xff] %vm4429_vm10, %v4435_v51  ;;  %1672 = vrot.lane.b32.xlu0 %v4433_v50, %s3820_s13 }
 0x280   : >> { %1674 = vrot.lane.b32.xlu0 %v4435_v51, %s3820_s13 }
 0x281   : >> { %v1625_v52 = vld [vmem:[#allocation2 + $0x18] sm:$0xff] }
 0x282   : >> { %v4445_v54 = vcombine.low %v1615_v34, %v1625_v52  ;;  %v4447_v44 = vcombine.high %v1615_v34, %v1625_v52 }
 0x283   : >> { %v3646_v57 = vld [vmem:[#allocation3] ss:$8 sps:$4 sm:$0xff]   ;;  %v3648_v58 = vld [vmem:[#allocation3 + $0x4] ss:$8 sps:$4 sm:$0xff]  }
 0x284   : >> { %1650 = vst.msk [vmem:[#allocation3 + $0x10] sm:$0xff] %vm4429_vm10, %v4445_v54  ;;  %1651 = vst.msk [vmem:[#allocation3 + $0x18] sm:$0xff] %vm4429_vm10, %v4447_v44  ;;  %1717 = vrot.lane.b32.xlu0 %v4433_v50, %s3821_s14  ;;  %1676 = vrot.lane.b32.xlu1 %v4445_v54, %s3820_s13 }
 0x285   : >> { %2702 = vmatprep.subr.bf16.mxu0 %v3648_v58 }
 0x286   : >> { %2703 = vmatpush1.bf16.msra.mxu0 %v3646_v57 }
 0x288   : >> { %1721 = vrot.lane.b32.xlu0 %v4445_v54, %s3821_s14  ;;  %1678 = vrot.lane.b32.xlu1 %v4447_v44, %s3820_s13 }
 0x28b   : >> { %v3649_v45 = vld [vmem:[#allocation3 + $0x10] ss:$8 sps:$4 sm:$0xff]   ;;  %v3651_v48 = vld [vmem:[#allocation3 + $0x14] ss:$8 sps:$4 sm:$0xff]  }
 0x28c   : >> { %1762 = vrot.lane.b32.xlu0 %v4433_v50, %s3822_s15  ;;  %1719 = vrot.lane.b32.xlu1 %v4435_v51, %s3821_s14 }
 0x28d   : >> { %2704 = vmatprep.subr.bf16.mxu0 %v3651_v48 }
 0x28e   : >> { %2705 = vmatpush1.bf16.msra.mxu0 %v3649_v45 }
 0x290   : >> { %1766 = vrot.lane.b32.xlu0 %v4445_v54, %s3822_s15  ;;  %1723 = vrot.lane.b32.xlu1 %v4447_v44, %s3821_s14 }
 0x294   : >> { %1807 = vrot.lane.b32.xlu0 %v4433_v50, %s3823_s16  ;;  %1764 = vrot.lane.b32.xlu1 %v4435_v51, %s3822_s15 }
 0x298   : >> { %1811 = vrot.lane.b32.xlu0 %v4445_v54, %s3823_s16  ;;  %1768 = vrot.lane.b32.xlu1 %v4447_v44, %s3822_s15 }
 0x29c   : >> { %1852 = vrot.lane.b32.xlu0 %v4433_v50, %s3824_s17  ;;  %1809 = vrot.lane.b32.xlu1 %v4435_v51, %s3823_s16 }
 0x2a0   : >> { %1856 = vrot.lane.b32.xlu0 %v4445_v54, %s3824_s17  ;;  %1813 = vrot.lane.b32.xlu1 %v4447_v44, %s3823_s16 }
 0x2a4   : >> { %1897 = vrot.lane.b32.xlu0 %v4433_v50, %s3825_s18  ;;  %1854 = vrot.lane.b32.xlu1 %v4435_v51, %s3824_s17 }
 0x2a8   : >> { %1901 = vrot.lane.b32.xlu0 %v4445_v54, %s3825_s18  ;;  %1858 = vrot.lane.b32.xlu1 %v4447_v44, %s3824_s17 }
 0x2ac   : >> { %1942 = vrot.lane.b32.xlu0 %v4433_v50, %s3826_s19  ;;  %1899 = vrot.lane.b32.xlu1 %v4435_v51, %s3825_s18 }
 0x2b0   : >> { %1946 = vrot.lane.b32.xlu0 %v4445_v54, %s3826_s19  ;;  %1903 = vrot.lane.b32.xlu1 %v4447_v44, %s3825_s18 }
 0x2b4   : >> { %1987 = vrot.lane.b32.xlu0 %v4433_v50, %s3827_s20  ;;  %1944 = vrot.lane.b32.xlu1 %v4435_v51, %s3826_s19 }
 0x2b8   : >> { %1991 = vrot.lane.b32.xlu0 %v4445_v54, %s3827_s20  ;;  %1948 = vrot.lane.b32.xlu1 %v4447_v44, %s3826_s19 }
 0x2bc   : >> { %2032 = vrot.lane.b32.xlu0 %v4433_v50, %s3828_s24  ;;  %1989 = vrot.lane.b32.xlu1 %v4435_v51, %s3827_s20 }
 0x2c0   : >> { %2036 = vrot.lane.b32.xlu0 %v4445_v54, %s3828_s24  ;;  %1993 = vrot.lane.b32.xlu1 %v4447_v44, %s3827_s20 }
 0x2c4   : >> { %2077 = vrot.lane.b32.xlu0 %v4433_v50, %s3829_s25  ;;  %2034 = vrot.lane.b32.xlu1 %v4435_v51, %s3828_s24 }
 0x2c8   : >> { %2081 = vrot.lane.b32.xlu0 %v4445_v54, %s3829_s25  ;;  %2038 = vrot.lane.b32.xlu1 %v4447_v44, %s3828_s24 }
 0x2cc   : >> { %2122 = vrot.lane.b32.xlu0 %v4433_v50, %s3830_s26  ;;  %2079 = vrot.lane.b32.xlu1 %v4435_v51, %s3829_s25 }
 0x2d0   : >> { %2126 = vrot.lane.b32.xlu0 %v4445_v54, %s3830_s26  ;;  %2083 = vrot.lane.b32.xlu1 %v4447_v44, %s3829_s25 }
 0x2d4   : >> { %2167 = vrot.lane.b32.xlu0 %v4433_v50, %s3831_s27  ;;  %2124 = vrot.lane.b32.xlu1 %v4435_v51, %s3830_s26 }
 0x2d8   : >> { %2171 = vrot.lane.b32.xlu0 %v4445_v54, %s3831_s27  ;;  %2128 = vrot.lane.b32.xlu1 %v4447_v44, %s3830_s26  ;;  %s3001_s26 = scalar_lea.vmem %s254_s22, %s3816_s11  ;;  %s286_s11 = sadd.s32 1, %s3816_s11  }
 0x2d9   : >> { %p283_p4 = scmp.ge.s32.totalorder %s286_s11, 16  }
 0x2dc   : >> { %2212 = vrot.lane.b32.xlu0 %v4433_v50, %s3832_s28  ;;  %2169 = vrot.lane.b32.xlu1 %v4435_v51, %s3831_s27 }
 0x2e0   : >> { %2216 = vrot.lane.b32.xlu0 %v4445_v54, %s3832_s28  ;;  %2173 = vrot.lane.b32.xlu1 %v4447_v44, %s3831_s27 }
 0x2e4   : >> { %2257 = vrot.lane.b32.xlu0 %v4433_v50, %s3833_s29  ;;  %2214 = vrot.lane.b32.xlu1 %v4435_v51, %s3832_s28 }
 0x2e8   : >> { %2261 = vrot.lane.b32.xlu0 %v4445_v54, %s3833_s29  ;;  %2218 = vrot.lane.b32.xlu1 %v4447_v44, %s3832_s28 }
 0x2ec   : >> { %2259 = vrot.lane.b32.xlu1 %v4435_v51, %s3833_s29 }
 0x2ee   : >> { %v1673_v49 = vpop.permute.xlu0 %1672 }
 0x2ef   : >> { %v1680_v55 = vrot.slane %v1673_v49, 4 }
 0x2f0   : >> { %2263 = vrot.lane.b32.xlu1 %v4447_v44, %s3833_s29 }
 0x2f1   : >> { %v1685_v56 = vsel %vm1684_vm8, %v1673_v49, %v1680_v55 }
 0x2f2   : >> { %1693 = vst.msk [vmem:[#allocation3 + $0x20] sm:$0xff] %vm4429_vm10, %v1685_v56  ;;  %v1675_v21 = vpop.permute.xlu0 %1674 }
 0x2f3   : >> { %v1681_v25 = vrot.slane %v1675_v21, 4 }
 0x2f5   : >> { %v1686_v18 = vsel %vm1684_vm8, %v1675_v21, %v1681_v25 }
 0x2f6   : >> { %1694 = vst.msk [vmem:[#allocation3 + $0x28] sm:$0xff] %vm4429_vm10, %v1686_v18  ;;  %v1718_v23 = vpop.permute.xlu0 %1717  ;;  %v1677_v28 = vpop.permute.xlu1 %1676 }
 0x2f7   : >> { %v1725_v32 = vrot.slane %v1718_v23, 4  ;;  %v1682_v59 = vrot.slane %v1677_v28, 4 }
 0x2f9   : >> { %v1730_v60 = vsel %vm1729_vm11, %v1718_v23, %v1725_v32  ;;  %v1687_v61 = vsel %vm1684_vm8, %v1677_v28, %v1682_v59 }
 0x2fa   : >> { %1738 = vst.msk [vmem:[#allocation3 + $0x40] sm:$0xff] %vm4429_vm10, %v1730_v60  ;;  %1695 = vst.msk [vmem:[#allocation3 + $0x30] sm:$0xff] %vm4429_vm10, %v1687_v61  ;;  %v1722_v62 = vpop.permute.xlu0 %1721  ;;  %v1679_v63 = vpop.permute.xlu1 %1678 }
 0x2fb   : >> { %v1727_v1 = vrot.slane %v1722_v62, 4  ;;  %v1683_v7 = vrot.slane %v1679_v63, 4 }
 0x2fd   : >> { %v1732_v15 = vsel %vm1729_vm11, %v1722_v62, %v1727_v1  ;;  %v1688_v17 = vsel %vm1684_vm8, %v1679_v63, %v1683_v7  ;;  %v3652_v19 = vld [vmem:[#allocation3 + $0x20] ss:$8 sps:$4 sm:$0xff]   ;;  %v3654_v22 = vld [vmem:[#allocation3 + $0x24] ss:$8 sps:$4 sm:$0xff]   ;;  %vm2269_vm8 = vcmask 932864  }
 0x2fe   : >> { %1740 = vst.msk [vmem:[#allocation3 + $0x50] sm:$0xff] %vm4429_vm10, %v1732_v15  ;;  %1696 = vst.msk [vmem:[#allocation3 + $0x38] sm:$0xff] %vm4429_vm10, %v1688_v17  ;;  %v1763_v26 = vpop.permute.xlu0 %1762  ;;  %v1720_v29 = vpop.permute.xlu1 %1719  ;;  %2706 = vmatprep.subr.bf16.mxu0 %v3654_v22 }
 0x2ff   : >> { %v1770_v30 = vrot.slane %v1763_v26, 4  ;;  %v1726_v35 = vrot.slane %v1720_v29, 4  ;;  %2707 = vmatpush1.bf16.msra.mxu0 %v3652_v19 }
 0x301   : >> { %v1775_v24 = vsel %vm1774_vm12, %v1763_v26, %v1770_v30  ;;  %v1731_v38 = vsel %vm1729_vm11, %v1720_v29, %v1726_v35 }
 0x302   : >> { %1783 = vst.msk [vmem:[#allocation3 + $0x60] sm:$0xff] %vm4429_vm10, %v1775_v24  ;;  %1739 = vst.msk [vmem:[#allocation3 + $0x48] sm:$0xff] %vm4429_vm10, %v1731_v38  ;;  %v1767_v39 = vpop.permute.xlu0 %1766  ;;  %v1724_v40 = vpop.permute.xlu1 %1723 }
 0x303   : >> { %v1772_v27 = vrot.slane %v1767_v39, 4  ;;  %v1728_v31 = vrot.slane %v1724_v40, 4 }
 0x305   : >> { %v1777_v41 = vsel %vm1774_vm12, %v1767_v39, %v1772_v27  ;;  %v1733_v42 = vsel %vm1729_vm11, %v1724_v40, %v1728_v31  ;;  %v3655_v36 = vld [vmem:[#allocation3 + $0x30] ss:$8 sps:$4 sm:$0xff]   ;;  %v3657_v20 = vld [vmem:[#allocation3 + $0x34] ss:$8 sps:$4 sm:$0xff]  }
 0x306   : >> { %1785 = vst.msk [vmem:[#allocation3 + $0x70] sm:$0xff] %vm4429_vm10, %v1777_v41  ;;  %1741 = vst.msk [vmem:[#allocation3 + $0x58] sm:$0xff] %vm4429_vm10, %v1733_v42  ;;  %v1808_v33 = vpop.permute.xlu0 %1807  ;;  %v1765_v34 = vpop.permute.xlu1 %1764  ;;  %2708 = vmatprep.subr.bf16.mxu0 %v3657_v20 }
 0x307   : >> { %v1815_v43 = vrot.slane %v1808_v33, 4  ;;  %v1771_v46 = vrot.slane %v1765_v34, 4  ;;  %2709 = vmatpush1.bf16.msra.mxu0 %v3655_v36 }
 0x309   : >> { %v1820_v37 = vsel %vm1819_vm13, %v1808_v33, %v1815_v43  ;;  %v1776_v50 = vsel %vm1774_vm12, %v1765_v34, %v1771_v46  ;;  %v3658_v51 = vld [vmem:[#allocation3 + $0x40] ss:$8 sps:$4 sm:$0xff]   ;;  %v3660_v52 = vld [vmem:[#allocation3 + $0x44] ss:$8 sps:$4 sm:$0xff]  }
 0x30a   : >> { %1828 = vst.msk [vmem:[#allocation3 + $0x80] sm:$0xff] %vm4429_vm10, %v1820_v37  ;;  %1784 = vst.msk [vmem:[#allocation3 + $0x68] sm:$0xff] %vm4429_vm10, %v1776_v50  ;;  %v1812_v54 = vpop.permute.xlu0 %1811  ;;  %v1769_v44 = vpop.permute.xlu1 %1768  ;;  %2710 = vmatprep.subr.bf16.mxu0 %v3660_v52 }
 0x30b   : >> { %v1817_v57 = vrot.slane %v1812_v54, 4  ;;  %v1773_v58 = vrot.slane %v1769_v44, 4  ;;  %2711 = vmatpush1.bf16.msra.mxu0 %v3658_v51 }
 0x30d   : >> { %v1822_v45 = vsel %vm1819_vm13, %v1812_v54, %v1817_v57  ;;  %v1778_v48 = vsel %vm1774_vm12, %v1769_v44, %v1773_v58  ;;  %v3661_v53 = vld [vmem:[#allocation3 + $0x50] ss:$8 sps:$4 sm:$0xff]   ;;  %v3663_v49 = vld [vmem:[#allocation3 + $0x54] ss:$8 sps:$4 sm:$0xff]  }
 0x30e   : >> { %1830 = vst.msk [vmem:[#allocation3 + $0x90] sm:$0xff] %vm4429_vm10, %v1822_v45  ;;  %1786 = vst.msk [vmem:[#allocation3 + $0x78] sm:$0xff] %vm4429_vm10, %v1778_v48  ;;  %v1853_v55 = vpop.permute.xlu0 %1852  ;;  %v1810_v56 = vpop.permute.xlu1 %1809  ;;  %2712 = vmatprep.subr.bf16.mxu0 %v3663_v49 }
 0x30f   : >> { %v1860_v21 = vrot.slane %v1853_v55, 4  ;;  %v1816_v25 = vrot.slane %v1810_v56, 4  ;;  %2713 = vmatpush1.bf16.msra.mxu0 %v3661_v53 }
 0x311   : >> { %v1865_v18 = vsel %vm1864_vm14, %v1853_v55, %v1860_v21  ;;  %v1821_v23 = vsel %vm1819_vm13, %v1810_v56, %v1816_v25  ;;  %v3664_v28 = vld [vmem:[#allocation3 + $0x60] ss:$8 sps:$4 sm:$0xff]   ;;  %v3666_v32 = vld [vmem:[#allocation3 + $0x64] ss:$8 sps:$4 sm:$0xff]  }
 0x312   : >> { %1873 = vst.msk [vmem:[#allocation3 + $0xa0] sm:$0xff] %vm4429_vm10, %v1865_v18  ;;  %1829 = vst.msk [vmem:[#allocation3 + $0x88] sm:$0xff] %vm4429_vm10, %v1821_v23  ;;  %v1857_v59 = vpop.permute.xlu0 %1856  ;;  %v1814_v60 = vpop.permute.xlu1 %1813  ;;  %2714 = vmatprep.subr.bf16.mxu0 %v3666_v32 }
 0x313   : >> { %v1862_v61 = vrot.slane %v1857_v59, 4  ;;  %v1818_v62 = vrot.slane %v1814_v60, 4  ;;  %2715 = vmatpush1.bf16.msra.mxu0 %v3664_v28 }
 0x315   : >> { %v1867_v63 = vsel %vm1864_vm14, %v1857_v59, %v1862_v61  ;;  %v1823_v1 = vsel %vm1819_vm13, %v1814_v60, %v1818_v62  ;;  %v3667_v7 = vld [vmem:[#allocation3 + $0x70] ss:$8 sps:$4 sm:$0xff]   ;;  %v3669_v15 = vld [vmem:[#allocation3 + $0x74] ss:$8 sps:$4 sm:$0xff]   ;;  %vm2888_vm13 = vcmask 482304  }
 0x316   : >> { %1875 = vst.msk [vmem:[#allocation3 + $0xb0] sm:$0xff] %vm4429_vm10, %v1867_v63  ;;  %1831 = vst.msk [vmem:[#allocation3 + $0x98] sm:$0xff] %vm4429_vm10, %v1823_v1  ;;  %v1898_v17 = vpop.permute.xlu0 %1897  ;;  %v1855_v19 = vpop.permute.xlu1 %1854  ;;  %2716 = vmatprep.subr.bf16.mxu0 %v3669_v15 }
 0x317   : >> { %v1905_v22 = vrot.slane %v1898_v17, 4  ;;  %v1861_v26 = vrot.slane %v1855_v19, 4  ;;  %2717 = vmatpush1.bf16.msra.mxu0 %v3667_v7 }
 0x319   : >> { %v1910_v29 = vsel %vm1909_vm15, %v1898_v17, %v1905_v22  ;;  %v1866_v30 = vsel %vm1864_vm14, %v1855_v19, %v1861_v26  ;;  %v3670_v35 = vld [vmem:[#allocation3 + $0x80] ss:$8 sps:$4 sm:$0xff]   ;;  %v3672_v24 = vld [vmem:[#allocation3 + $0x84] ss:$8 sps:$4 sm:$0xff]  }
 0x31a   : >> { %1918 = vst.msk [vmem:[#allocation3 + $0xc0] sm:$0xff] %vm4429_vm10, %v1910_v29  ;;  %1874 = vst.msk [vmem:[#allocation3 + $0xa8] sm:$0xff] %vm4429_vm10, %v1866_v30  ;;  %v1902_v38 = vpop.permute.xlu0 %1901  ;;  %v1859_v39 = vpop.permute.xlu1 %1858  ;;  %2718 = vmatprep.subr.bf16.mxu0 %v3672_v24 }
 0x31b   : >> { %v1907_v40 = vrot.slane %v1902_v38, 4  ;;  %v1863_v27 = vrot.slane %v1859_v39, 4  ;;  %2719 = vmatpush1.bf16.msra.mxu0 %v3670_v35 }
 0x31d   : >> { %v1912_v31 = vsel %vm1909_vm15, %v1902_v38, %v1907_v40  ;;  %v1868_v41 = vsel %vm1864_vm14, %v1859_v39, %v1863_v27  ;;  %v3673_v42 = vld [vmem:[#allocation3 + $0x90] ss:$8 sps:$4 sm:$0xff]   ;;  %v3675_v36 = vld [vmem:[#allocation3 + $0x94] ss:$8 sps:$4 sm:$0xff]  }
 0x31e   : >> { %1920 = vst.msk [vmem:[#allocation3 + $0xd0] sm:$0xff] %vm4429_vm10, %v1912_v31  ;;  %1876 = vst.msk [vmem:[#allocation3 + $0xb8] sm:$0xff] %vm4429_vm10, %v1868_v41  ;;  %v1943_v20 = vpop.permute.xlu0 %1942  ;;  %v1900_v33 = vpop.permute.xlu1 %1899  ;;  %2720 = vmatprep.subr.bf16.mxu0 %v3675_v36 }
 0x31f   : >> { %v1950_v34 = vrot.slane %v1943_v20, 4  ;;  %v1906_v43 = vrot.slane %v1900_v33, 4  ;;  %2721 = vmatpush1.bf16.msra.mxu0 %v3673_v42 }
 0x321   : >> { %v1955_v46 = vsel %vm1954_vm1, %v1943_v20, %v1950_v34  ;;  %v1911_v37 = vsel %vm1909_vm15, %v1900_v33, %v1906_v43  ;;  %v3676_v50 = vld [vmem:[#allocation3 + $0xa0] ss:$8 sps:$4 sm:$0xff]   ;;  %v3678_v51 = vld [vmem:[#allocation3 + $0xa4] ss:$8 sps:$4 sm:$0xff]   ;;  %v3302_v43 = vcombine.low %v3880_v0, %v3913_v8 }
 0x322   : >> { %1963 = vst.msk [vmem:[#allocation3 + $0xe0] sm:$0xff] %vm4429_vm10, %v1955_v46  ;;  %1919 = vst.msk [vmem:[#allocation3 + $0xc8] sm:$0xff] %vm4429_vm10, %v1911_v37  ;;  %v1947_v52 = vpop.permute.xlu0 %1946  ;;  %v1904_v54 = vpop.permute.xlu1 %1903  ;;  %2722 = vmatprep.subr.bf16.mxu0 %v3678_v51  ;;  %v3307_v46 = vcombine.high %v3923_v10, %v3938_v12 }
 0x323   : >> { %v1952_v44 = vrot.slane %v1947_v52, 4  ;;  %v1908_v57 = vrot.slane %v1904_v54, 4  ;;  %2723 = vmatpush1.bf16.msra.mxu0 %v3676_v50 }
 0x325   : >> { %v1957_v58 = vsel %vm1954_vm1, %v1947_v52, %v1952_v44  ;;  %v1913_v45 = vsel %vm1909_vm15, %v1904_v54, %v1908_v57  ;;  %v3679_v48 = vld [vmem:[#allocation3 + $0xb0] ss:$8 sps:$4 sm:$0xff]   ;;  %v3681_v53 = vld [vmem:[#allocation3 + $0xb4] ss:$8 sps:$4 sm:$0xff]  }
 0x326   : >> { %1965 = vst.msk [vmem:[#allocation3 + $0xf0] sm:$0xff] %vm4429_vm10, %v1957_v58  ;;  %1921 = vst.msk [vmem:[#allocation3 + $0xd8] sm:$0xff] %vm4429_vm10, %v1913_v45  ;;  %v1988_v49 = vpop.permute.xlu0 %1987  ;;  %v1945_v55 = vpop.permute.xlu1 %1944  ;;  %2724 = vmatprep.subr.bf16.mxu0 %v3681_v53 }
 0x327   : >> { %v1995_v56 = vrot.slane %v1988_v49, 4  ;;  %v1951_v21 = vrot.slane %v1945_v55, 4  ;;  %2725 = vmatpush1.bf16.msra.mxu0 %v3679_v48 }
 0x329   : >> { %v2000_v25 = vsel %vm1999_vm2, %v1988_v49, %v1995_v56  ;;  %v1956_v18 = vsel %vm1954_vm1, %v1945_v55, %v1951_v21  ;;  %v3682_v23 = vld [vmem:[#allocation3 + $0xc0] ss:$8 sps:$4 sm:$0xff]   ;;  %v3684_v28 = vld [vmem:[#allocation3 + $0xc4] ss:$8 sps:$4 sm:$0xff]  }
 0x32a   : >> { %2008 = vst.msk [vmem:[#allocation3 + $0x100] sm:$0xff] %vm4429_vm10, %v2000_v25  ;;  %1964 = vst.msk [vmem:[#allocation3 + $0xe8] sm:$0xff] %vm4429_vm10, %v1956_v18  ;;  %v1992_v32 = vpop.permute.xlu0 %1991  ;;  %v1949_v59 = vpop.permute.xlu1 %1948  ;;  %2726 = vmatprep.subr.bf16.mxu0 %v3684_v28  ;;  %v3306_v18 = vcombine.low %v3923_v10, %v3938_v12 }
 0x32b   : >> { %v1997_v60 = vrot.slane %v1992_v32, 4  ;;  %v1953_v61 = vrot.slane %v1949_v59, 4  ;;  %2727 = vmatpush1.bf16.msra.mxu0 %v3682_v23  ;;  %v3305_v23 = vcombine.high %v3886_v2, %v3918_v9 }
 0x32d   : >> { %v2002_v62 = vsel %vm1999_vm2, %v1992_v32, %v1997_v60  ;;  %v1958_v63 = vsel %vm1954_vm1, %v1949_v59, %v1953_v61  ;;  %v3685_v1 = vld [vmem:[#allocation3 + $0xd0] ss:$8 sps:$4 sm:$0xff]   ;;  %v3687_v7 = vld [vmem:[#allocation3 + $0xd4] ss:$8 sps:$4 sm:$0xff]  }
 0x32e   : >> { %2010 = vst.msk [vmem:[#allocation3 + $0x110] sm:$0xff] %vm4429_vm10, %v2002_v62  ;;  %1966 = vst.msk [vmem:[#allocation3 + $0xf8] sm:$0xff] %vm4429_vm10, %v1958_v63  ;;  %v2033_v15 = vpop.permute.xlu0 %2032  ;;  %v1990_v17 = vpop.permute.xlu1 %1989  ;;  %2728 = vmatprep.subr.bf16.mxu0 %v3687_v7 }
 0x32f   : >> { %v2040_v19 = vrot.slane %v2033_v15, 4  ;;  %v1996_v22 = vrot.slane %v1990_v17, 4  ;;  %2729 = vmatpush1.bf16.msra.mxu0 %v3685_v1 }
 0x331   : >> { %v2045_v26 = vsel %vm2044_vm3, %v2033_v15, %v2040_v19  ;;  %v2001_v29 = vsel %vm1999_vm2, %v1990_v17, %v1996_v22  ;;  %v3688_v30 = vld [vmem:[#allocation3 + $0xe0] ss:$8 sps:$4 sm:$0xff]   ;;  %v3690_v35 = vld [vmem:[#allocation3 + $0xe4] ss:$8 sps:$4 sm:$0xff]  }
 0x332   : >> { %2053 = vst.msk [vmem:[#allocation3 + $0x120] sm:$0xff] %vm4429_vm10, %v2045_v26  ;;  %2009 = vst.msk [vmem:[#allocation3 + $0x108] sm:$0xff] %vm4429_vm10, %v2001_v29  ;;  %v2037_v24 = vpop.permute.xlu0 %2036  ;;  %v1994_v38 = vpop.permute.xlu1 %1993  ;;  %2730 = vmatprep.subr.bf16.mxu0 %v3690_v35 }
 0x333   : >> { %v2042_v39 = vrot.slane %v2037_v24, 4  ;;  %v1998_v40 = vrot.slane %v1994_v38, 4  ;;  %2731 = vmatpush1.bf16.msra.mxu0 %v3688_v30 }
 0x335   : >> { %v2047_v27 = vsel %vm2044_vm3, %v2037_v24, %v2042_v39  ;;  %v2003_v31 = vsel %vm1999_vm2, %v1994_v38, %v1998_v40  ;;  %v3691_v41 = vld [vmem:[#allocation3 + $0xf0] ss:$8 sps:$4 sm:$0xff]   ;;  %v3693_v42 = vld [vmem:[#allocation3 + $0xf4] ss:$8 sps:$4 sm:$0xff]  }
 0x336   : >> { %2055 = vst.msk [vmem:[#allocation3 + $0x130] sm:$0xff] %vm4429_vm10, %v2047_v27  ;;  %2011 = vst.msk [vmem:[#allocation3 + $0x118] sm:$0xff] %vm4429_vm10, %v2003_v31  ;;  %v2078_v36 = vpop.permute.xlu0 %2077  ;;  %v2035_v20 = vpop.permute.xlu1 %2034  ;;  %2732 = vmatprep.subr.bf16.mxu0 %v3693_v42 }
 0x337   : >> { %v2085_v33 = vrot.slane %v2078_v36, 4  ;;  %v2041_v34 = vrot.slane %v2035_v20, 4  ;;  %2733 = vmatpush1.bf16.msra.mxu0 %v3691_v41 }
 0x339   : >> { %v2090_v37 = vsel %vm2089_vm4, %v2078_v36, %v2085_v33  ;;  %v2046_v50 = vsel %vm2044_vm3, %v2035_v20, %v2041_v34  ;;  %v3694_v51 = vld [vmem:[#allocation3 + $0x100] ss:$8 sps:$4 sm:$0xff]   ;;  %v3696_v52 = vld [vmem:[#allocation3 + $0x104] ss:$8 sps:$4 sm:$0xff]  }
 0x33a   : >> { %2098 = vst.msk [vmem:[#allocation3 + $0x140] sm:$0xff] %vm4429_vm10, %v2090_v37  ;;  %2054 = vst.msk [vmem:[#allocation3 + $0x128] sm:$0xff] %vm4429_vm10, %v2046_v50  ;;  %v2082_v54 = vpop.permute.xlu0 %2081  ;;  %v2039_v44 = vpop.permute.xlu1 %2038  ;;  %2755 = vmatprep.subr.bf16.mxu0 %v3696_v52  ;;  %2735 = vmatmul.mubr.bf16.vlgmr.msra.gmra.mrb[24].mxu0 %v3302_v43 }
 0x33b   : >> { %v2087_v57 = vrot.slane %v2082_v54, 4  ;;  %v2043_v58 = vrot.slane %v2039_v44, 4  ;;  %2756 = vmatpush1.bf16.msra.mxu0 %v3694_v51  ;;  %2744 = vmatprep.mubr.bf16.mxu0 %v3307_v46 }
 0x33d   : >> { %v2092_v45 = vsel %vm2089_vm4, %v2082_v54, %v2087_v57  ;;  %v2048_v48 = vsel %vm2044_vm3, %v2039_v44, %v2043_v58  ;;  %v3697_v53 = vld [vmem:[#allocation3 + $0x110] ss:$8 sps:$4 sm:$0xff]   ;;  %v3699_v49 = vld [vmem:[#allocation3 + $0x114] ss:$8 sps:$4 sm:$0xff]  }
 0x33e   : >> { %2100 = vst.msk [vmem:[#allocation3 + $0x150] sm:$0xff] %vm4429_vm10, %v2092_v45  ;;  %2056 = vst.msk [vmem:[#allocation3 + $0x138] sm:$0xff] %vm4429_vm10, %v2048_v48  ;;  %v2123_v55 = vpop.permute.xlu0 %2122  ;;  %v2080_v56 = vpop.permute.xlu1 %2079  ;;  %2757 = vmatprep.subr.bf16.mxu0 %v3699_v49 }
 0x33f   : >> { %v2130_v21 = vrot.slane %v2123_v55, 4  ;;  %v2086_v25 = vrot.slane %v2080_v56, 4  ;;  %2758 = vmatpush1.bf16.msra.mxu0 %v3697_v53 }
 0x341   : >> { %v2135_v28 = vsel %vm2134_vm5, %v2123_v55, %v2130_v21  ;;  %v2091_v32 = vsel %vm2089_vm4, %v2080_v56, %v2086_v25  ;;  %v3700_v59 = vld [vmem:[#allocation3 + $0x120] ss:$8 sps:$4 sm:$0xff]   ;;  %v3702_v60 = vld [vmem:[#allocation3 + $0x124] ss:$8 sps:$4 sm:$0xff]  }
 0x342   : >> { %2143 = vst.msk [vmem:[#allocation3 + $0x160] sm:$0xff] %vm4429_vm10, %v2135_v28  ;;  %2099 = vst.msk [vmem:[#allocation3 + $0x148] sm:$0xff] %vm4429_vm10, %v2091_v32  ;;  %v2127_v61 = vpop.permute.xlu0 %2126  ;;  %v2084_v62 = vpop.permute.xlu1 %2083  ;;  %2759 = vmatprep.subr.bf16.mxu0 %v3702_v60  ;;  %2745 = vmatmul.mubr.bf16.gmra.mrb[28].mxu0 %v3306_v18 }
 0x343   : >> { %v2132_v63 = vrot.slane %v2127_v61, 4  ;;  %v2088_v1 = vrot.slane %v2084_v62, 4  ;;  %2760 = vmatpush1.bf16.msra.mxu0 %v3700_v59  ;;  %3372 = vmatprep.mubr.msk.bf16.mxu0 %vm2686_vm6, %v3305_v23 }
 0x345   : >> { %v2137_v7 = vsel %vm2134_vm5, %v2127_v61, %v2132_v63  ;;  %v2093_v15 = vsel %vm2089_vm4, %v2084_v62, %v2088_v1  ;;  %v3703_v17 = vld [vmem:[#allocation3 + $0x130] ss:$8 sps:$4 sm:$0xff]   ;;  %v3705_v19 = vld [vmem:[#allocation3 + $0x134] ss:$8 sps:$4 sm:$0xff]   ;;  %vm2940_vm4 = vcmask 130112  }
 0x346   : >> { %2145 = vst.msk [vmem:[#allocation3 + $0x170] sm:$0xff] %vm4429_vm10, %v2137_v7  ;;  %2101 = vst.msk [vmem:[#allocation3 + $0x158] sm:$0xff] %vm4429_vm10, %v2093_v15  ;;  %v2168_v22 = vpop.permute.xlu0 %2167  ;;  %v2125_v26 = vpop.permute.xlu1 %2124  ;;  %2761 = vmatprep.subr.bf16.mxu0 %v3705_v19 }
 0x347   : >> { %v2175_v29 = vrot.slane %v2168_v22, 4  ;;  %v2131_v30 = vrot.slane %v2125_v26, 4  ;;  %2762 = vmatpush1.bf16.msra.mxu0 %v3703_v17 }
 0x349   : >> { %v2180_v35 = vsel %vm2179_vm7, %v2168_v22, %v2175_v29  ;;  %v2136_v24 = vsel %vm2134_vm5, %v2125_v26, %v2131_v30  ;;  %v3706_v38 = vld [vmem:[#allocation3 + $0x140] ss:$8 sps:$4 sm:$0xff]   ;;  %v3708_v39 = vld [vmem:[#allocation3 + $0x144] ss:$8 sps:$4 sm:$0xff]  }
 0x34a   : >> { %2188 = vst.msk [vmem:[#allocation3 + $0x180] sm:$0xff] %vm4429_vm10, %v2180_v35  ;;  %2144 = vst.msk [vmem:[#allocation3 + $0x168] sm:$0xff] %vm4429_vm10, %v2136_v24  ;;  %v2172_v40 = vpop.permute.xlu0 %2171  ;;  %v2129_v27 = vpop.permute.xlu1 %2128  ;;  %2763 = vmatprep.subr.bf16.mxu0 %v3708_v39 }
 0x34b   : >> { %v2177_v31 = vrot.slane %v2172_v40, 4  ;;  %v2133_v41 = vrot.slane %v2129_v27, 4  ;;  %2764 = vmatpush1.bf16.msra.mxu0 %v3706_v38 }
 0x34d   : >> { %v2182_v42 = vsel %vm2179_vm7, %v2172_v40, %v2177_v31  ;;  %v2138_v36 = vsel %vm2134_vm5, %v2129_v27, %v2133_v41  ;;  %v3709_v20 = vld [vmem:[#allocation3 + $0x150] ss:$8 sps:$4 sm:$0xff]   ;;  %v3711_v33 = vld [vmem:[#allocation3 + $0x154] ss:$8 sps:$4 sm:$0xff]   ;;  %v2342_v27 = vld [vmem:[#allocation3 + $0x1e0] sm:$0x11] }
 0x34e   : >> { %2190 = vst.msk [vmem:[#allocation3 + $0x190] sm:$0xff] %vm4429_vm10, %v2182_v42  ;;  %2146 = vst.msk [vmem:[#allocation3 + $0x178] sm:$0xff] %vm4429_vm10, %v2138_v36  ;;  %v2213_v34 = vpop.permute.xlu0 %2212  ;;  %v2170_v43 = vpop.permute.xlu1 %2169  ;;  %2765 = vmatprep.subr.bf16.mxu0 %v3711_v33  ;;  %v3371_v42 = vcombine.high %v2342_v27, %v2342_v27  ;;  %v2695_v36 = vsel %vm258_vm0, 65535, %v3818_v16  ;;  %v3308_v16 = vcombine.low %v3933_v11, %v3943_v13  ;;  %vm2947_vm5 = vcmask 195712  }
 0x34f   : >> { %v2220_v46 = vrot.slane %v2213_v34, 4  ;;  %v2176_v37 = vrot.slane %v2170_v43, 4  ;;  %2766 = vmatpush1.bf16.msra.mxu0 %v3709_v20  ;;  %v3370_v20 = vcombine.low %v2342_v27, %v2342_v27  ;;  %v2859_v27 = vld [vmem:[%s4790_s4 + $0x18] sm:$0xff] }
 0x351   : >> { %v2225_v50 = vsel %vm2224_vm9, %v2213_v34, %v2220_v46  ;;  %v2181_v51 = vsel %vm2179_vm7, %v2170_v43, %v2176_v37  ;;  %v3712_v52 = vld [vmem:[#allocation3 + $0x160] ss:$8 sps:$4 sm:$0xff]   ;;  %v3714_v54 = vld [vmem:[#allocation3 + $0x164] ss:$8 sps:$4 sm:$0xff]   ;;  %v2700_v43 = vand.u32 %v3371_v42, %v2695_v36  ;;  %v2697_v46 = vand.u32 %v3370_v20, %v2695_v36  ;;  %v2858_v36 = vld [vmem:[%s4790_s4 + $0x10] sm:$0xff] }
 0x352   : >> { %2233 = vst.msk [vmem:[#allocation3 + $0x1a0] sm:$0xff] %vm4429_vm10, %v2225_v50  ;;  %2189 = vst.msk [vmem:[#allocation3 + $0x188] sm:$0xff] %vm4429_vm10, %v2181_v51  ;;  %v2217_v44 = vpop.permute.xlu0 %2216  ;;  %v2174_v57 = vpop.permute.xlu1 %2173  ;;  %2767 = vmatprep.subr.bf16.mxu0 %v3714_v54  ;;  %v3309_v37 = vcombine.high %v3933_v11, %v3943_v13 }
 0x353   : >> { %v2222_v58 = vrot.slane %v2217_v44, 4  ;;  %v2178_v45 = vrot.slane %v2174_v57, 4  ;;  %2768 = vmatpush1.bf16.msra.mxu0 %v3712_v52 }
 0x355   : >> { %v2227_v48 = vsel %vm2224_vm9, %v2217_v44, %v2222_v58  ;;  %v2183_v53 = vsel %vm2179_vm7, %v2174_v57, %v2178_v45  ;;  %v3715_v49 = vld [vmem:[#allocation3 + $0x170] ss:$8 sps:$4 sm:$0xff]   ;;  %v3717_v55 = vld [vmem:[#allocation3 + $0x174] ss:$8 sps:$4 sm:$0xff]   ;;  %vm2975_vm7 = vcmask 1041409  }
 0x356   : >> { %2235 = vst.msk [vmem:[#allocation3 + $0x1b0] sm:$0xff] %vm4429_vm10, %v2227_v48  ;;  %2191 = vst.msk [vmem:[#allocation3 + $0x198] sm:$0xff] %vm4429_vm10, %v2183_v53  ;;  %v2258_v56 = vpop.permute.xlu0 %2257  ;;  %v2215_v21 = vpop.permute.xlu1 %2214  ;;  %2769 = vmatprep.subr.bf16.mxu0 %v3717_v55 }
 0x357   : >> { %v2265_v25 = vrot.slane %v2258_v56, 4  ;;  %v2221_v18 = vrot.slane %v2215_v21, 4  ;;  %2770 = vmatpush1.bf16.msra.mxu0 %v3715_v49 }
 0x359   : >> { %v2270_v23 = vsel %vm2269_vm8, %v2258_v56, %v2265_v25  ;;  %v2226_v28 = vsel %vm2224_vm9, %v2215_v21, %v2221_v18  ;;  %v3718_v32 = vld [vmem:[#allocation3 + $0x180] ss:$8 sps:$4 sm:$0xff]   ;;  %v3720_v59 = vld [vmem:[#allocation3 + $0x184] ss:$8 sps:$4 sm:$0xff]  }
 0x35a   : >> { %2278 = vst.msk [vmem:[#allocation3 + $0x1c0] sm:$0xff] %vm4429_vm10, %v2270_v23  ;;  %2234 = vst.msk [vmem:[#allocation3 + $0x1a8] sm:$0xff] %vm4429_vm10, %v2226_v28  ;;  %v2262_v60 = vpop.permute.xlu0 %2261  ;;  %v2219_v61 = vpop.permute.xlu1 %2218  ;;  %2771 = vmatprep.subr.bf16.mxu0 %v3720_v59 }
 0x35b   : >> { %v2267_v62 = vrot.slane %v2262_v60, 4  ;;  %v2223_v63 = vrot.slane %v2219_v61, 4  ;;  %2772 = vmatpush1.bf16.msra.mxu0 %v3718_v32 }
 0x35d   : >> { %v2272_v1 = vsel %vm2269_vm8, %v2262_v60, %v2267_v62  ;;  %v2228_v7 = vsel %vm2224_vm9, %v2219_v61, %v2223_v63  ;;  %v3721_v15 = vld [vmem:[#allocation3 + $0x190] ss:$8 sps:$4 sm:$0xff]   ;;  %v3723_v17 = vld [vmem:[#allocation3 + $0x194] ss:$8 sps:$4 sm:$0xff]   ;;  %vm2978_vm9 = vcmask 254976  }
 0x35e   : >> { %2280 = vst.msk [vmem:[#allocation3 + $0x1d0] sm:$0xff] %vm4429_vm10, %v2272_v1  ;;  %2236 = vst.msk [vmem:[#allocation3 + $0x1b8] sm:$0xff] %vm4429_vm10, %v2228_v7  ;;  %v2260_v19 = vpop.permute.xlu1 %2259  ;;  %2773 = vmatprep.subr.bf16.mxu0 %v3723_v17 }
 0x35f   : >> { %v2266_v22 = vrot.slane %v2260_v19, 4  ;;  %2774 = vmatpush1.bf16.msra.mxu0 %v3721_v15 }
 0x361   : >> { %v2271_v26 = vsel %vm2269_vm8, %v2260_v19, %v2266_v22  ;;  %v3724_v29 = vld [vmem:[#allocation3 + $0x1a0] ss:$8 sps:$4 sm:$0xff]   ;;  %v3726_v30 = vld [vmem:[#allocation3 + $0x1a4] ss:$8 sps:$4 sm:$0xff]  }
 0x362   : >> { %2279 = vst.msk [vmem:[#allocation3 + $0x1c8] sm:$0xff] %vm4429_vm10, %v2271_v26  ;;  %v2264_v35 = vpop.permute.xlu1 %2263  ;;  %2775 = vmatprep.subr.bf16.mxu0 %v3726_v30  ;;  %v2857_v22 = vld [vmem:[%s4790_s4 + $0x8] sm:$0xff] }
 0x363   : >> { %v2268_v24 = vrot.slane %v2264_v35, 4  ;;  %2776 = vmatpush1.bf16.msra.mxu0 %v3724_v29  ;;  %v2865_v26 = vld [vmem:[%s4790_s4 + $0x48] sm:$0xff] }
 0x365   : >> { %v2273_v38 = vsel %vm2269_vm8, %v2264_v35, %v2268_v24  ;;  %v3727_v39 = vld [vmem:[#allocation3 + $0x1b0] ss:$8 sps:$4 sm:$0xff]   ;;  %v3729_v40 = vld [vmem:[#allocation3 + $0x1b4] ss:$8 sps:$4 sm:$0xff]   ;;  %v2856_v24 = vld [vmem:[%s4790_s4] sm:$0xff]  ;;  %vm3002_vm8 = vcmask 8192  }
 0x366   : >> { %2281 = vst.msk [vmem:[#allocation3 + $0x1d8] sm:$0xff] %vm4429_vm10, %v2273_v38  ;;  %2777 = vmatprep.subr.bf16.mxu0 %v3729_v40  ;;  %v2864_v38 = vld [vmem:[%s4790_s4 + $0x40] sm:$0xff] }
 0x367   : >> { %2778 = vmatpush1.bf16.msra.mxu0 %v3727_v39 }
 0x369   : >> { %v3730_v31 = vld [vmem:[#allocation3 + $0x1c0] ss:$8 sps:$4 sm:$0xff]   ;;  %v3732_v41 = vld [vmem:[#allocation3 + $0x1c4] ss:$8 sps:$4 sm:$0xff]  }
 0x36a   : >> { %2779 = vmatprep.subr.bf16.mxu0 %v3732_v41 }
 0x36b   : >> { %2780 = vmatpush1.bf16.msra.mxu0 %v3730_v31  ;;  %v2867_v31 = vld [vmem:[%s4790_s4 + $0x58] sm:$0xff] }
 0x36d   : >> { %v3733_v33 = vld [vmem:[#allocation3 + $0x1d0] ss:$8 sps:$4 sm:$0xff]   ;;  %v3735_v34 = vld [vmem:[#allocation3 + $0x1d4] ss:$8 sps:$4 sm:$0xff]  }
 0x36e   : >> { %2781 = vmatprep.subr.bf16.mxu0 %v3735_v34 }
 0x36f   : >> { %2782 = vmatpush1.bf16.msra.mxu0 %v3733_v33  ;;  %v2866_v33 = vld [vmem:[%s4790_s4 + $0x50] sm:$0xff] }
 0x370   : >> { %2783 = vmatprep.subr.bf16.mxu0 %v2700_v43 }
 0x373   : >> { %2784 = vmatpush1.bf16.msra.mxu0 %v2697_v46 }
 0x376   : >> { %2788 = vmatmul.mubr.bf16.vlgmr.msra.gmra.mrb[24].mxu0 %v3304_v47 }
 0x377   : >> { %3373 = vmatprep.mubr.msk.bf16.mxu0 %vm2686_vm6, %v3309_v37  ;;  %vm2954_vm6 = vcmask 261312  }
 0x37e   : >> { %2798 = vmatmul.mubr.bf16.gmra.mrb[28].mxu0 %v3308_v16 }
 0x449   : >> { %v2789_v50 = vpop.f32.mrb[24].mxu0 }
 0x44a   : >> { %v2816_v51 = vmin.f32 %v2789_v50, 0.0  ;;  %v2791_v52 = vpop.f32.mrb[25].mxu0  ;;  %vm2808_vm10 = vcmp.gt.f32.partialorder %v2789_v50, 0.0 }
 0x44b   : >> { %v2817_v54 = vmin.f32 %v2791_v52, 0.0  ;;  %v2793_v44 = vpop.f32.mrb[26].mxu0  ;;  %vm2809_vm11 = vcmp.gt.f32.partialorder %v2791_v52, 0.0 }
 0x44c   : >> { %v2824_v57 = vmul.f32 1.442695, %v2816_v51  ;;  %v2818_v58 = vmin.f32 %v2793_v44, 0.0  ;;  %v2795_v45 = vpop.f32.mrb[27].mxu0  ;;  %vm2810_vm12 = vcmp.gt.f32.partialorder %v2793_v44, 0.0 }
 0x44d   : >> { %v2826_v48 = vmul.f32 1.442695, %v2817_v54  ;;  %v2819_v53 = vmin.f32 %v2795_v45, 0.0  ;;  %vm2811_vm14 = vcmp.gt.f32.partialorder %v2795_v45, 0.0 }
 0x44e   : >> { %3786 = vpow2.f32 %v2824_v57  ;;  %v2828_v49 = vmul.f32 1.442695, %v2818_v58 }
 0x44f   : >> { %3788 = vpow2.f32 %v2826_v48  ;;  %v2830_v55 = vmul.f32 1.442695, %v2819_v53 }
 0x450   : >> { %3790 = vpow2.f32 %v2828_v49 }
 0x451   : >> { %3792 = vpow2.f32 %v2830_v55  ;;  %v4697_v56 = vpop.f32.mrb[28].mxu0 }
 0x452   : >> { %v2820_v21 = vmin.f32 %v4697_v56, 0.0  ;;  %v4700_v25 = vpop.f32.mrb[29].mxu0  ;;  %vm2812_vm15 = vcmp.gt.f32.partialorder %v4697_v56, 0.0 }
 0x453   : >> { %v2821_v18 = vmin.f32 %v4700_v25, 0.0  ;;  %v4703_v23 = vpop.f32.mrb[30].mxu0  ;;  %vm2813_vm1 = vcmp.gt.f32.partialorder %v4700_v25, 0.0 }
 0x454   : >> { %v2832_v28 = vmul.f32 1.442695, %v2820_v21  ;;  %v2822_v32 = vmin.f32 %v4703_v23, 0.0  ;;  %v4706_v59 = vpop.f32.mrb[31].mxu0  ;;  %vm2814_vm2 = vcmp.gt.f32.partialorder %v4703_v23, 0.0 }
 0x455   : >> { %v2834_v60 = vmul.f32 1.442695, %v2821_v18  ;;  %v2823_v61 = vmin.f32 %v4706_v59, 0.0  ;;  %vm2815_vm3 = vcmp.gt.f32.partialorder %v4706_v59, 0.0 }
 0x456   : >> { %3794 = vpow2.f32 %v2832_v28  ;;  %v2836_v62 = vmul.f32 1.442695, %v2822_v32  ;;  %v2861_v28 = vld [vmem:[%s4790_s4 + $0x28] sm:$0xff] }
 0x457   : >> { %3796 = vpow2.f32 %v2834_v60  ;;  %v2838_v63 = vmul.f32 1.442695, %v2823_v61  ;;  %v2869_v32 = vld [vmem:[%s4790_s4 + $0x68] sm:$0xff] }
 0x458   : >> { %v3787_v1 = vpop.eup %3786  ;;  %3798 = vpow2.f32 %v2836_v62 }
 0x459   : >> { %v3789_v7 = vpop.eup %3788  ;;  %v3374_v15 = vadd.f32 -1.0, %v3787_v1  ;;  %3800 = vpow2.f32 %v2838_v63  ;;  %v2860_v63 = vld [vmem:[%s4790_s4 + $0x20] sm:$0xff] }
 0x45a   : >> { %v3791_v17 = vpop.eup %3790  ;;  %v3375_v19 = vadd.f32 -1.0, %v3789_v7  ;;  %v2868_v1 = vld [vmem:[%s4790_s4 + $0x60] sm:$0xff] }
 0x45b   : >> { %v3793_v29 = vpop.eup %3792  ;;  %v2848_v30 = vsel %vm2808_vm10, %v2789_v50, %v3374_v15  ;;  %v3376_v35 = vadd.f32 -1.0, %v3791_v17  ;;  %v2871_v17 = vld [vmem:[%s4790_s4 + $0x78] sm:$0xff] }
 0x45c   : >> { %v2849_v39 = vsel %vm2809_vm11, %v2791_v52, %v3375_v19  ;;  %v3377_v40 = vadd.f32 -1.0, %v3793_v29  ;;  %v2872_v43 = vmul.f32 %v2856_v24, %v2848_v30  ;;  %v2880_v46 = vmul.f32 %v2864_v38, %v2848_v30  ;;  %v2870_v29 = vld [vmem:[%s4790_s4 + $0x70] sm:$0xff] }
 0x45d   : >> { %v2850_v41 = vsel %vm2810_vm12, %v2793_v44, %v3376_v35  ;;  %v2873_v42 = vmul.f32 %v2857_v22, %v2849_v39  ;;  %v2881_v20 = vmul.f32 %v2865_v26, %v2849_v39 }
 0x45e   : >> { %v2851_v34 = vsel %vm2811_vm14, %v2795_v45, %v3377_v40  ;;  %v2874_v54 = vmul.f32 %v2858_v36, %v2850_v41  ;;  %v2882_v57 = vmul.f32 %v2866_v33, %v2850_v41 }
 0x45f   : >> { %v2889_v47 = vsel %vm2888_vm13, %v2873_v42, 0.0  ;;  %v2875_v37 = vmul.f32 %v2859_v27, %v2851_v34  ;;  %v2905_v16 = vsel %vm2888_vm13, %v2881_v20, 0.0  ;;  %v2883_v50 = vmul.f32 %v2867_v31, %v2851_v34 }
 0x460   : >> { %v3795_v51 = vpop.eup %3794  ;;  %v2890_v52 = vadd.f32 %v2889_v47, %v2872_v43  ;;  %v2906_v44 = vadd.f32 %v2905_v16, %v2880_v46  ;;  %v2929_v34 = vlaneseq }
 0x461   : >> { %v3797_v58 = vpop.eup %3796  ;;  %v3378_v48 = vadd.f32 -1.0, %v3795_v51  ;;  %v2893_v53 = vsel %vm2888_vm13, %v2875_v37, 0.0  ;;  %v2909_v49 = vsel %vm2888_vm13, %v2883_v50, 0.0 }
 0x462   : >> { %v3799_v45 = vpop.eup %3798  ;;  %v3379_v55 = vadd.f32 -1.0, %v3797_v58  ;;  %2891 = vadd.xlane.f32.xlu0 %v2890_v52  ;;  %v2894_v21 = vadd.f32 %v2893_v53, %v2874_v54  ;;  %v2910_v18 = vadd.f32 %v2909_v49, %v2882_v57  ;;  %v2930_v46 = vand.u32 127, %v2929_v34 }
 0x463   : >> { %v3801_v60 = vpop.eup %3800  ;;  %v2852_v61 = vsel %vm2812_vm15, %v4697_v56, %v3378_v48  ;;  %v3380_v62 = vadd.f32 -1.0, %v3799_v45  ;;  %v2863_v56 = vld [vmem:[%s4790_s4 + $0x38] sm:$0xff]  ;;  %v2932_v51 = vshrl.u32 %v2929_v34, 7 }
 0x464   : >> { %v2853_v7 = vsel %vm2813_vm1, %v4700_v25, %v3379_v55  ;;  %v3381_v15 = vadd.f32 -1.0, %v3801_v60  ;;  %2895 = vadd.xlane.f32.xlu1 %v2894_v21  ;;  %v2862_v25 = vld [vmem:[%s4790_s4 + $0x30] sm:$0xff]  ;;  %v2876_v35 = vmul.f32 %v2860_v63, %v2852_v61  ;;  %v2884_v24 = vmul.f32 %v2868_v1, %v2852_v61 }
 0x465   : >> { %v2854_v19 = vsel %vm2814_vm2, %v4703_v23, %v3380_v62  ;;  %v2877_v22 = vmul.f32 %v2861_v28, %v2853_v7  ;;  %v2885_v26 = vmul.f32 %v2869_v32, %v2853_v7  ;;  %v2935_v16 = vadd.s32 4294967288, %v2930_v46 }
 0x466   : >> { %v2855_v30 = vsel %vm2815_vm3, %v4706_v59, %v3381_v15  ;;  %2907 = vadd.xlane.f32.xlu0 %v2906_v44  ;;  %v2878_v41 = vmul.f32 %v2862_v25, %v2854_v19  ;;  %v2886_v42 = vmul.f32 %v2870_v29, %v2854_v19  ;;  %v2942_v50 = vadd.s32 4294967280, %v2930_v46 }
 0x467   : >> { %v2879_v38 = vmul.f32 %v2863_v56, %v2855_v30  ;;  %v2887_v39 = vmul.f32 %v2871_v17, %v2855_v30  ;;  %v2897_v23 = vsel %vm2888_vm13, %v2877_v22, 0.0  ;;  %v2913_v40 = vsel %vm2888_vm13, %v2885_v26, 0.0 }
 0x468   : >> { %v2898_v27 = vadd.f32 %v2897_v23, %v2876_v35  ;;  %v2914_v31 = vadd.f32 %v2913_v40, %v2884_v24  ;;  %v2949_v52 = vadd.s32 4294967272, %v2930_v46  ;;  %v2938_v57 = vsub.s32 %v2935_v16, %v2932_v51 }
 0x469   : >> { %v2901_v36 = vsel %vm2888_vm13, %v2879_v38, 0.0  ;;  %v2917_v20 = vsel %vm2888_vm13, %v2887_v39, 0.0  ;;  %v2945_v58 = vsub.s32 %v2942_v50, %v2932_v51  ;;  %v2933_v48 = vsub.s32 %v2930_v46, %v2932_v51 }
 0x46a   : >> { %2911 = vadd.xlane.f32.xlu0 %v2910_v18  ;;  %2899 = vadd.xlane.f32.xlu1 %v2898_v27  ;;  %v2902_v59 = vadd.f32 %v2901_v36, %v2878_v41  ;;  %v2918_v33 = vadd.f32 %v2917_v20, %v2886_v42  ;;  %v2952_v53 = vsub.s32 %v2949_v52, %v2932_v51 }
 0x46e   : >> { %2915 = vadd.xlane.f32.xlu0 %v2914_v31  ;;  %2903 = vadd.xlane.f32.xlu1 %v2902_v59 }
 0x472   : >> { %2919 = vadd.xlane.f32.xlu0 %v2918_v33 }
 0x488   : >> { %2988 = vbcast.lane.b32.xlu0 %v3948_v14, 256 }
 0x4ef   : >> { %v2892_v43 = vpop.xlane.xlu0 %2891 }
 0x4f0   : >> { %v2934_v32 = vrot.slane %v2892_v43, %v2933_v48 }
 0x4f1   : >> { %v2896_v47 = vpop.xlane.xlu1 %2895 }
 0x4f2   : >> { %v2939_v55 = vrot.slane %v2896_v47, %v2938_v57 }
 0x4f3   : >> { %v2908_v37 = vpop.xlane.xlu0 %2907 }
 0x4f4   : >> { %v2959_v60 = vrot.slane %v2908_v37, %v2933_v48  ;;  %v2941_v63 = vsel %vm2940_vm4, %v2939_v55, %v2934_v32 }
 0x4f7   : >> { %v2912_v54 = vpop.xlane.xlu0 %2911  ;;  %v2900_v44 = vpop.xlane.xlu1 %2899 }
 0x4f8   : >> { %v2963_v21 = vrot.slane %v2912_v54, %v2938_v57  ;;  %v2946_v18 = vrot.slane %v2900_v44, %v2945_v58 }
 0x4fa   : >> { %v2964_v1 = vsel %vm2940_vm4, %v2963_v21, %v2959_v60  ;;  %v2948_v15 = vsel %vm2947_vm5, %v2946_v18, %v2941_v63 }
 0x4fb   : >> { %v2916_v49 = vpop.xlane.xlu0 %2915  ;;  %v2904_v45 = vpop.xlane.xlu1 %2903 }
 0x4fc   : >> { %v2968_v28 = vrot.slane %v2916_v49, %v2945_v58  ;;  %v2953_v61 = vrot.slane %v2904_v45, %v2952_v53 }
 0x4fe   : >> { %v2969_v56 = vsel %vm2947_vm5, %v2968_v28, %v2964_v1  ;;  %v2955_v17 = vsel %vm2954_vm6, %v2953_v61, %v2948_v15 }
 0x4ff   : >> { %v2920_v62 = vpop.xlane.xlu0 %2919 }
 0x500   : >> { %v2973_v7 = vrot.slane %v2920_v62, %v2952_v53 }
 0x502   : >> { %v2974_v19 = vsel %vm2954_vm6, %v2973_v7, %v2969_v56 }
 0x503   : >> { %v2976_v22 = vsel %vm2975_vm7, %v2974_v19, %v2955_v17  ;;  %v2989_v25 = vpop.permute.xlu0 %2988 }
 0x504   : >> { %v2979_v26 = vsel %vm2978_vm9, %v2976_v22, 0.0 }
 0x505   : >> { %2980 = vadd.xlane.f32.xlu1 %v2979_v26 }
 0x592   : >> { %v2981_v29 = vpop.xlane.xlu1 %2980 }
 0x593   : >> { %v2991_v30 = vadd.f32 %v2989_v25, %v2981_v29 }
 0x595   : >> { %2994 = vperm.xlu1 %3443, %v2991_v30  }
 0x611   : > { %285 = sbr.rel (!%p283_p4) target bundleno = 17 (0x11), region = 83 }
 0x614   : >> { %v2995_v35 = vpop.permute.xlu1 %2994 }
 0x615   : >> { %v2999_v24 = vrot.slane %v2995_v35, %v2933_v48 }
 0x617   : >> { %3003 = vst.msk [vmem:[%s3001_s26] sm:$0x1] %vm3002_vm8, %v2999_v24 }
 0x618 PF: > { %s16_s21 = sadd.s32 1, %s3812_s21  }
 0x619   : > { %p13_p5 = scmp.ge.s32.totalorder %s16_s21, 4  }
 0x61b   :  { %15 = sbr.rel (!%p13_p5) target bundleno = 1 (0x1), region = 94 }

</bundles_post_ra>
